<compile_context>
chip_gen: v7x
topology: tpu7x:2x2x1
jax: 0.10.0
libtpu: 0.0.40
codegen_flags: <defaults>
</compile_context>

<pallas_src>
import functools

import jax
import jax.numpy as jnp
import numpy as np
from jax.experimental import pallas as pl
from jax.experimental.pallas import tpu as pltpu


# ---------------------------------------------------------------------------
# Kernels
# ---------------------------------------------------------------------------

def _tds_conv2d_block_kernel(x_ref, a_ref, cb_ref, g_ref, b_ref, o_ref, *,
                             kernel_width, t_out, mxu_dtype):
    """TDSConv2dBlock (conv + ReLU + residual + LayerNorm) for one sample.

    x_ref : (1, T_in, C)   input features (f32), C = channels * width
    a_ref : (K, C, C)      conv weights expanded over `width` (block diagonal)
    cb_ref: (1, C)         conv bias replicated over width
    g_ref : (1, C)         LayerNorm gamma
    b_ref : (1, C)         LayerNorm beta
    o_ref : (1, T_out, C)  output, T_out = T_in - K + 1
    """
    c = o_ref.shape[-1]
    acc = jnp.zeros((t_out, c), jnp.float32)
    # Temporal conv as K lane-dense matmuls accumulated in f32 on the MXU.
    for k in range(kernel_width):                           # K static -> unrolled
        xk = x_ref[0, pl.ds(k, t_out), :].astype(mxu_dtype)
        ak = a_ref[k].astype(mxu_dtype)
        acc += jnp.dot(xk, ak, preferred_element_type=jnp.float32)
    # Single bias add + ReLU (f32, VPU).
    y = jnp.maximum(acc + cb_ref[...], 0.0)
    # Residual with the last T_out timesteps of the (f32) input.
    y = y + x_ref[0, pl.ds(kernel_width - 1, t_out), :]
    # LayerNorm over the feature (lane) axis, f32.
    m = jnp.mean(y, axis=-1, keepdims=True)
    v = jnp.mean(jnp.square(y - m), axis=-1, keepdims=True)
    y = (y - m) * jax.lax.rsqrt(v + 1e-5) * g_ref[...] + b_ref[...]
    o_ref[0] = y.astype(o_ref.dtype)


def _tds_fc_block_kernel(x_ref, w1_ref, b1_ref, w2_ref, b2_ref, g_ref, b_ref,
                         o_ref, *, mxu_dtype):
    """TDSFullyConnectedBlock (Linear-ReLU-Linear + residual + LN), one sample.

    x_ref : (1, T, C);  w1_ref/w2_ref: (C, C);  b1/b2/g/b: (1, C);  o_ref: (1, T, C)
    """
    x = x_ref[0]                                            # (T, C) f32
    h = jnp.dot(x.astype(mxu_dtype), w1_ref[...].astype(mxu_dtype),
                preferred_element_type=jnp.float32) + b1_ref[...]
    h = jnp.maximum(h, 0.0)
    y = jnp.dot(h.astype(mxu_dtype), w2_ref[...].astype(mxu_dtype),
                preferred_element_type=jnp.float32) + b2_ref[...]
    y = y + x                                               # residual (f32)
    m = jnp.mean(y, axis=-1, keepdims=True)
    v = jnp.mean(jnp.square(y - m), axis=-1, keepdims=True)
    y = (y - m) * jax.lax.rsqrt(v + 1e-5) * g_ref[...] + b_ref[...]
    o_ref[0] = y.astype(o_ref.dtype)


# ---------------------------------------------------------------------------
# pallas_call wrappers (one call per TDS block)
# ---------------------------------------------------------------------------

def _conv_block_call(feats, blk, kernel_width, mxu_dtype):
    n, t_in, c = feats.shape
    t_out = t_in - kernel_width + 1
    kernel = functools.partial(_tds_conv2d_block_kernel,
                               kernel_width=kernel_width, t_out=t_out,
                               mxu_dtype=mxu_dtype)
    return pl.pallas_call(
        kernel,
        out_shape=jax.ShapeDtypeStruct((n, t_out, c), feats.dtype),
        grid_spec=pltpu.PrefetchScalarGridSpec(
            num_scalar_prefetch=0,
            grid=(n,),
            in_specs=[
                pl.BlockSpec((1, t_in, c), lambda i: (i, 0, 0)),
                pl.BlockSpec((kernel_width, c, c), lambda i: (0, 0, 0)),
                pl.BlockSpec((1, c), lambda i: (0, 0)),
                pl.BlockSpec((1, c), lambda i: (0, 0)),
                pl.BlockSpec((1, c), lambda i: (0, 0)),
            ],
            out_specs=pl.BlockSpec((1, t_out, c), lambda i: (i, 0, 0)),
        ),
        compiler_params=pltpu.CompilerParams(
            dimension_semantics=("parallel",)),
    )(feats, blk["conv_a"], blk["conv_b_row"], blk["ln_g"], blk["ln_b"])


def _fc_block_call(feats, blk, mxu_dtype):
    n, t, c = feats.shape
    kernel = functools.partial(_tds_fc_block_kernel, mxu_dtype=mxu_dtype)
    return pl.pallas_call(
        kernel,
        out_shape=jax.ShapeDtypeStruct((n, t, c), feats.dtype),
        grid_spec=pltpu.PrefetchScalarGridSpec(
            num_scalar_prefetch=0,
            grid=(n,),
            in_specs=[
                pl.BlockSpec((1, t, c), lambda i: (i, 0, 0)),
                pl.BlockSpec((c, c), lambda i: (0, 0)),
                pl.BlockSpec((1, c), lambda i: (0, 0)),
                pl.BlockSpec((c, c), lambda i: (0, 0)),
                pl.BlockSpec((1, c), lambda i: (0, 0)),
                pl.BlockSpec((1, c), lambda i: (0, 0)),
                pl.BlockSpec((1, c), lambda i: (0, 0)),
            ],
            out_specs=pl.BlockSpec((1, t, c), lambda i: (i, 0, 0)),
        ),
        compiler_params=pltpu.CompilerParams(
            dimension_semantics=("parallel",)),
    )(feats, blk["w1"], blk["b1"], blk["w2"], blk["b2"],
      blk["ln_g"], blk["ln_b"])


def tds_conv_encoder(x, params, *, kernel_width, mxu_dtype=jnp.bfloat16):
    """x: (T, N, num_features) -> (T_out, N, num_features)."""
    feats = jnp.transpose(x, (1, 0, 2))          # (N, T, C): one grid block per n
    for blk in params:
        if blk["type"] == "conv":
            feats = _conv_block_call(feats, blk, kernel_width, mxu_dtype)
        else:
            feats = _fc_block_call(feats, blk, mxu_dtype)
    return jnp.transpose(feats, (1, 0, 2))       # back to (T_out, N, C)


# ---------------------------------------------------------------------------
# Params (PyTorch-style init) + pure-JAX reference
# ---------------------------------------------------------------------------

def init_params(key, num_features, block_channels, kernel_width):
    """Per-block params with nn.Conv2d / nn.Linear-style uniform init.

    Also precomputes the width-expanded conv weights the Pallas kernel
    consumes (one-time param transform, not forward work).
    """
    params = []
    keys = jax.random.split(key, len(block_channels))
    for channels, kb in zip(block_channels, keys):
        assert num_features % channels == 0
        width = num_features // channels
        kc = jax.random.split(kb, 10)
        # --- TDSConv2dBlock ---
        lim_c = 1.0 / np.sqrt(channels * kernel_width)      # Conv2d fan-in (kh=1)
        conv_w = jax.random.uniform(kc[0], (channels, channels, kernel_width),
                                    jnp.float32, -lim_c, lim_c)  # (out, in, K)
        conv_b = jax.random.uniform(kc[1], (channels,), jnp.float32,
                                    -lim_c, lim_c)
        # Expand over width: a[k, ci*W+w, co*W+w] = conv_w[co, ci, k]
        eye_w = jnp.eye(width, dtype=jnp.float32)
        conv_a = jnp.einsum("oik,wv->kiwov", conv_w, eye_w).reshape(
            kernel_width, num_features, num_features)
        conv_b_row = jnp.repeat(conv_b, width)[None, :]          # (1, C)
        params.append(dict(
            type="conv", channels=channels, width=width,
            conv_w=conv_w, conv_b=conv_b,
            conv_a=conv_a, conv_b_row=conv_b_row,
            ln_g=1.0 + 0.2 * jax.random.uniform(kc[2], (1, num_features),
                                                jnp.float32, -1.0, 1.0),
            ln_b=0.1 * jax.random.uniform(kc[3], (1, num_features),
                                          jnp.float32, -1.0, 1.0),
        ))
        # --- TDSFullyConnectedBlock ---
        lim_f = 1.0 / np.sqrt(num_features)
        params.append(dict(
            type="fc",
            w1=jax.random.uniform(kc[4], (num_features, num_features),
                                  jnp.float32, -lim_f, lim_f),
            b1=jax.random.uniform(kc[5], (1, num_features), jnp.float32,
                                  -lim_f, lim_f),
            w2=jax.random.uniform(kc[6], (num_features, num_features),
                                  jnp.float32, -lim_f, lim_f),
            b2=jax.random.uniform(kc[7], (1, num_features), jnp.float32,
                                  -lim_f, lim_f),
            ln_g=1.0 + 0.2 * jax.random.uniform(kc[8], (1, num_features),
                                                jnp.float32, -1.0, 1.0),
            ln_b=0.1 * jax.random.uniform(kc[9], (1, num_features),
                                          jnp.float32, -1.0, 1.0),
        ))
    return params


def _layernorm(x, g, b, eps=1e-5):
    m = jnp.mean(x, axis=-1, keepdims=True)
    v = jnp.mean(jnp.square(x - m), axis=-1, keepdims=True)
    return (x - m) * jax.lax.rsqrt(v + eps) * g + b


def reference(x, params, kernel_width):
    """Pure-JAX mirror of the PyTorch TDSConvEncoder.forward."""
    hp = jax.lax.Precision.HIGHEST
    feats = x                                                # (T, N, C)
    for blk in params:
        if blk["type"] == "conv":
            ch, wd = blk["channels"], blk["width"]
            t_in, n, c = feats.shape
            t_out = t_in - kernel_width + 1
            xr = jnp.transpose(feats, (1, 2, 0)).reshape(n, ch, wd, t_in)
            acc = blk["conv_b"][None, :, None, None]
            for k in range(kernel_width):
                acc = acc + jnp.einsum("oi,niwt->nowt", blk["conv_w"][:, :, k],
                                       xr[:, :, :, k:k + t_out], precision=hp)
            acc = jnp.maximum(acc, 0.0)
            y = jnp.transpose(acc.reshape(n, c, t_out), (2, 0, 1))  # (T_out,N,C)
            y = y + feats[-t_out:]
            feats = _layernorm(y, blk["ln_g"][0], blk["ln_b"][0])
        else:
            h = jnp.maximum(
                jnp.einsum("tnc,cd->tnd", feats, blk["w1"], precision=hp)
                + blk["b1"][0], 0.0)
            y = jnp.einsum("tnd,de->tne", h, blk["w2"], precision=hp) + blk["b2"][0]
            y = y + feats
            feats = _layernorm(y, blk["ln_g"][0], blk["ln_b"][0])
    return feats


if __name__ == "__main__":
    # Small shapes consistent with the module: input (T, N, num_features) with
    # num_features = channels * width.
    T, N = 32, 2
    NUM_FEATURES = 128                 # lane-dense (multiple of 128)
    BLOCK_CHANNELS = (4, 4)            # 2x (TDSConv2dBlock + TDSFullyConnectedBlock)
    KERNEL_WIDTH = 9                   # T: 32 -> 24 -> 16

    key = jax.random.PRNGKey(0)
    kx, kp = jax.random.split(key)
    x = jax.random.normal(kx, (T, N, NUM_FEATURES), dtype=jnp.float32)
    params = init_params(kp, NUM_FEATURES, BLOCK_CHANNELS, KERNEL_WIDTH)

    ref = jax.block_until_ready(reference(x, params, KERNEL_WIDTH))
    t_out = T - len(BLOCK_CHANNELS) * (KERNEL_WIDTH - 1)
    assert ref.shape == (t_out, N, NUM_FEATURES), ref.shape

    # f32 MXU path: strict correctness check against the reference.
    out_f32 = jax.block_until_ready(
        tds_conv_encoder(x, params, kernel_width=KERNEL_WIDTH,
                         mxu_dtype=jnp.float32))
    assert out_f32.shape == ref.shape, out_f32.shape
    np.testing.assert_allclose(np.asarray(out_f32), np.asarray(ref),
                               rtol=2e-3, atol=2e-3)

    # bf16 MXU-operand path (perf config for v5e/v6e/v7x): relaxed tolerance;
    # bias/ReLU/residual/LayerNorm stay in f32 inside the kernels.
    out_bf16 = jax.block_until_ready(
        tds_conv_encoder(x, params, kernel_width=KERNEL_WIDTH,
                         mxu_dtype=jnp.bfloat16))
    np.testing.assert_allclose(np.asarray(out_bf16), np.asarray(ref),
                               rtol=1e-1, atol=1e-1)

    print("KERNEL_OK")
</pallas_src>

<mosaic_0001>
module attributes {stable_mosaic.version = 11 : i64} {
  func.func @_tds_conv2d_block_kernel(%arg0: i32, %arg1: memref<1x32x128xf32, #tpu.memory_space<vmem>>, %arg2: memref<9x128x128xf32, #tpu.memory_space<vmem>>, %arg3: memref<1x128xf32, #tpu.memory_space<vmem>>, %arg4: memref<1x128xf32, #tpu.memory_space<vmem>>, %arg5: memref<1x128xf32, #tpu.memory_space<vmem>>, %arg6: memref<1x24x128xf32, #tpu.memory_space<vmem>>) attributes {dimension_semantics = [#tpu.dimension_semantics<parallel>], iteration_bounds = array<i64: 2>, scalar_prefetch = 0 : i64, scratch_operands = 0 : i64, tpu.core_type = #tpu.core_type<tc>, window_params = [{transform_indices = @transform_0, window_bounds = array<i64: 1, 32, 128>}, {pipeline_mode = #tpu.pipeline_mode<synchronous>, transform_indices = @transform_1, window_bounds = array<i64: 9, 128, 128>}, {pipeline_mode = #tpu.pipeline_mode<synchronous>, transform_indices = @transform_2, window_bounds = array<i64: 1, 128>}, {pipeline_mode = #tpu.pipeline_mode<synchronous>, transform_indices = @transform_3, window_bounds = array<i64: 1, 128>}, {pipeline_mode = #tpu.pipeline_mode<synchronous>, transform_indices = @transform_4, window_bounds = array<i64: 1, 128>}, {transform_indices = @transform_5, window_bounds = array<i64: 1, 24, 128>}]} {
    %cst = arith.constant 0.000000e+00 : f32
    %0 = vector.broadcast %cst : f32 to vector<24x128xf32>
    %c0 = arith.constant 0 : index
    %c0_0 = arith.constant 0 : index
    %c0_1 = arith.constant 0 : index
    %1 = vector.load %arg1[%c0, %c0_0, %c0_1] : memref<1x32x128xf32, #tpu.memory_space<vmem>>, vector<1x24x128xf32>
    %2 = vector.shape_cast %1 : vector<1x24x128xf32> to vector<24x128xf32>
    %c0_2 = arith.constant 0 : index
    %c0_3 = arith.constant 0 : index
    %c0_4 = arith.constant 0 : index
    %3 = vector.load %arg2[%c0_2, %c0_3, %c0_4] : memref<9x128x128xf32, #tpu.memory_space<vmem>>, vector<1x128x128xf32>
    %4 = vector.shape_cast %3 : vector<1x128x128xf32> to vector<128x128xf32>
    %cst_5 = arith.constant dense<0.000000e+00> : vector<24x128xf32>
    %5 = tpu.matmul %2, %4, %cst_5 {dimension_numbers = #tpu.dot_dimension_numbers<[1], [0], [0], [1], [0, 0, 1, 1], [], []>} : vector<24x128xf32>, vector<128x128xf32>, vector<24x128xf32> -> vector<24x128xf32>
    %6 = arith.addf %0, %5 : vector<24x128xf32>
    %c0_6 = arith.constant 0 : index
    %c1 = arith.constant 1 : index
    %c0_7 = arith.constant 0 : index
    %7 = vector.load %arg1[%c0_6, %c1, %c0_7] : memref<1x32x128xf32, #tpu.memory_space<vmem>>, vector<1x24x128xf32>
    %8 = vector.shape_cast %7 : vector<1x24x128xf32> to vector<24x128xf32>
    %c1_8 = arith.constant 1 : index
    %c0_9 = arith.constant 0 : index
    %c0_10 = arith.constant 0 : index
    %9 = vector.load %arg2[%c1_8, %c0_9, %c0_10] : memref<9x128x128xf32, #tpu.memory_space<vmem>>, vector<1x128x128xf32>
    %10 = vector.shape_cast %9 : vector<1x128x128xf32> to vector<128x128xf32>
    %cst_11 = arith.constant dense<0.000000e+00> : vector<24x128xf32>
    %11 = tpu.matmul %8, %10, %cst_11 {dimension_numbers = #tpu.dot_dimension_numbers<[1], [0], [0], [1], [0, 0, 1, 1], [], []>} : vector<24x128xf32>, vector<128x128xf32>, vector<24x128xf32> -> vector<24x128xf32>
    %12 = arith.addf %6, %11 : vector<24x128xf32>
    %c0_12 = arith.constant 0 : index
    %c2 = arith.constant 2 : index
    %c0_13 = arith.constant 0 : index
    %13 = vector.load %arg1[%c0_12, %c2, %c0_13] : memref<1x32x128xf32, #tpu.memory_space<vmem>>, vector<1x24x128xf32>
    %14 = vector.shape_cast %13 : vector<1x24x128xf32> to vector<24x128xf32>
    %c2_14 = arith.constant 2 : index
    %c0_15 = arith.constant 0 : index
    %c0_16 = arith.constant 0 : index
    %15 = vector.load %arg2[%c2_14, %c0_15, %c0_16] : memref<9x128x128xf32, #tpu.memory_space<vmem>>, vector<1x128x128xf32>
    %16 = vector.shape_cast %15 : vector<1x128x128xf32> to vector<128x128xf32>
    %cst_17 = arith.constant dense<0.000000e+00> : vector<24x128xf32>
    %17 = tpu.matmul %14, %16, %cst_17 {dimension_numbers = #tpu.dot_dimension_numbers<[1], [0], [0], [1], [0, 0, 1, 1], [], []>} : vector<24x128xf32>, vector<128x128xf32>, vector<24x128xf32> -> vector<24x128xf32>
    %18 = arith.addf %12, %17 : vector<24x128xf32>
    %c0_18 = arith.constant 0 : index
    %c3 = arith.constant 3 : index
    %c0_19 = arith.constant 0 : index
    %19 = vector.load %arg1[%c0_18, %c3, %c0_19] : memref<1x32x128xf32, #tpu.memory_space<vmem>>, vector<1x24x128xf32>
    %20 = vector.shape_cast %19 : vector<1x24x128xf32> to vector<24x128xf32>
    %c3_20 = arith.constant 3 : index
    %c0_21 = arith.constant 0 : index
    %c0_22 = arith.constant 0 : index
    %21 = vector.load %arg2[%c3_20, %c0_21, %c0_22] : memref<9x128x128xf32, #tpu.memory_space<vmem>>, vector<1x128x128xf32>
    %22 = vector.shape_cast %21 : vector<1x128x128xf32> to vector<128x128xf32>
    %cst_23 = arith.constant dense<0.000000e+00> : vector<24x128xf32>
    %23 = tpu.matmul %20, %22, %cst_23 {dimension_numbers = #tpu.dot_dimension_numbers<[1], [0], [0], [1], [0, 0, 1, 1], [], []>} : vector<24x128xf32>, vector<128x128xf32>, vector<24x128xf32> -> vector<24x128xf32>
    %24 = arith.addf %18, %23 : vector<24x128xf32>
    %c0_24 = arith.constant 0 : index
    %c4 = arith.constant 4 : index
    %c0_25 = arith.constant 0 : index
    %25 = vector.load %arg1[%c0_24, %c4, %c0_25] : memref<1x32x128xf32, #tpu.memory_space<vmem>>, vector<1x24x128xf32>
    %26 = vector.shape_cast %25 : vector<1x24x128xf32> to vector<24x128xf32>
    %c4_26 = arith.constant 4 : index
    %c0_27 = arith.constant 0 : index
    %c0_28 = arith.constant 0 : index
    %27 = vector.load %arg2[%c4_26, %c0_27, %c0_28] : memref<9x128x128xf32, #tpu.memory_space<vmem>>, vector<1x128x128xf32>
    %28 = vector.shape_cast %27 : vector<1x128x128xf32> to vector<128x128xf32>
    %cst_29 = arith.constant dense<0.000000e+00> : vector<24x128xf32>
    %29 = tpu.matmul %26, %28, %cst_29 {dimension_numbers = #tpu.dot_dimension_numbers<[1], [0], [0], [1], [0, 0, 1, 1], [], []>} : vector<24x128xf32>, vector<128x128xf32>, vector<24x128xf32> -> vector<24x128xf32>
    %30 = arith.addf %24, %29 : vector<24x128xf32>
    %c0_30 = arith.constant 0 : index
    %c5 = arith.constant 5 : index
    %c0_31 = arith.constant 0 : index
    %31 = vector.load %arg1[%c0_30, %c5, %c0_31] : memref<1x32x128xf32, #tpu.memory_space<vmem>>, vector<1x24x128xf32>
    %32 = vector.shape_cast %31 : vector<1x24x128xf32> to vector<24x128xf32>
    %c5_32 = arith.constant 5 : index
    %c0_33 = arith.constant 0 : index
    %c0_34 = arith.constant 0 : index
    %33 = vector.load %arg2[%c5_32, %c0_33, %c0_34] : memref<9x128x128xf32, #tpu.memory_space<vmem>>, vector<1x128x128xf32>
    %34 = vector.shape_cast %33 : vector<1x128x128xf32> to vector<128x128xf32>
    %cst_35 = arith.constant dense<0.000000e+00> : vector<24x128xf32>
    %35 = tpu.matmul %32, %34, %cst_35 {dimension_numbers = #tpu.dot_dimension_numbers<[1], [0], [0], [1], [0, 0, 1, 1], [], []>} : vector<24x128xf32>, vector<128x128xf32>, vector<24x128xf32> -> vector<24x128xf32>
    %36 = arith.addf %30, %35 : vector<24x128xf32>
    %c0_36 = arith.constant 0 : index
    %c6 = arith.constant 6 : index
    %c0_37 = arith.constant 0 : index
    %37 = vector.load %arg1[%c0_36, %c6, %c0_37] : memref<1x32x128xf32, #tpu.memory_space<vmem>>, vector<1x24x128xf32>
    %38 = vector.shape_cast %37 : vector<1x24x128xf32> to vector<24x128xf32>
    %c6_38 = arith.constant 6 : index
    %c0_39 = arith.constant 0 : index
    %c0_40 = arith.constant 0 : index
    %39 = vector.load %arg2[%c6_38, %c0_39, %c0_40] : memref<9x128x128xf32, #tpu.memory_space<vmem>>, vector<1x128x128xf32>
    %40 = vector.shape_cast %39 : vector<1x128x128xf32> to vector<128x128xf32>
    %cst_41 = arith.constant dense<0.000000e+00> : vector<24x128xf32>
    %41 = tpu.matmul %38, %40, %cst_41 {dimension_numbers = #tpu.dot_dimension_numbers<[1], [0], [0], [1], [0, 0, 1, 1], [], []>} : vector<24x128xf32>, vector<128x128xf32>, vector<24x128xf32> -> vector<24x128xf32>
    %42 = arith.addf %36, %41 : vector<24x128xf32>
    %c0_42 = arith.constant 0 : index
    %c7 = arith.constant 7 : index
    %c0_43 = arith.constant 0 : index
    %43 = vector.load %arg1[%c0_42, %c7, %c0_43] : memref<1x32x128xf32, #tpu.memory_space<vmem>>, vector<1x24x128xf32>
    %44 = vector.shape_cast %43 : vector<1x24x128xf32> to vector<24x128xf32>
    %c7_44 = arith.constant 7 : index
    %c0_45 = arith.constant 0 : index
    %c0_46 = arith.constant 0 : index
    %45 = vector.load %arg2[%c7_44, %c0_45, %c0_46] : memref<9x128x128xf32, #tpu.memory_space<vmem>>, vector<1x128x128xf32>
    %46 = vector.shape_cast %45 : vector<1x128x128xf32> to vector<128x128xf32>
    %cst_47 = arith.constant dense<0.000000e+00> : vector<24x128xf32>
    %47 = tpu.matmul %44, %46, %cst_47 {dimension_numbers = #tpu.dot_dimension_numbers<[1], [0], [0], [1], [0, 0, 1, 1], [], []>} : vector<24x128xf32>, vector<128x128xf32>, vector<24x128xf32> -> vector<24x128xf32>
    %48 = arith.addf %42, %47 : vector<24x128xf32>
    %c0_48 = arith.constant 0 : index
    %c8 = arith.constant 8 : index
    %c0_49 = arith.constant 0 : index
    %49 = vector.load %arg1[%c0_48, %c8, %c0_49] : memref<1x32x128xf32, #tpu.memory_space<vmem>>, vector<1x24x128xf32>
    %50 = vector.shape_cast %49 : vector<1x24x128xf32> to vector<24x128xf32>
    %c8_50 = arith.constant 8 : index
    %c0_51 = arith.constant 0 : index
    %c0_52 = arith.constant 0 : index
    %51 = vector.load %arg2[%c8_50, %c0_51, %c0_52] : memref<9x128x128xf32, #tpu.memory_space<vmem>>, vector<1x128x128xf32>
    %52 = vector.shape_cast %51 : vector<1x128x128xf32> to vector<128x128xf32>
    %cst_53 = arith.constant dense<0.000000e+00> : vector<24x128xf32>
    %53 = tpu.matmul %50, %52, %cst_53 {dimension_numbers = #tpu.dot_dimension_numbers<[1], [0], [0], [1], [0, 0, 1, 1], [], []>} : vector<24x128xf32>, vector<128x128xf32>, vector<24x128xf32> -> vector<24x128xf32>
    %54 = arith.addf %48, %53 : vector<24x128xf32>
    %c0_54 = arith.constant 0 : index
    %c0_55 = arith.constant 0 : index
    %55 = vector.load %arg3[%c0_54, %c0_55] : memref<1x128xf32, #tpu.memory_space<vmem>>, vector<1x128xf32>
    %56 = vector.broadcast %55 : vector<1x128xf32> to vector<24x128xf32>
    %57 = arith.addf %54, %56 : vector<24x128xf32>
    %cst_56 = arith.constant 0.000000e+00 : f32
    %58 = vector.broadcast %cst_56 : f32 to vector<24x128xf32>
    %59 = arith.maximumf %57, %58 : vector<24x128xf32>
    %c0_57 = arith.constant 0 : index
    %c8_58 = arith.constant 8 : index
    %c0_59 = arith.constant 0 : index
    %60 = vector.load %arg1[%c0_57, %c8_58, %c0_59] : memref<1x32x128xf32, #tpu.memory_space<vmem>>, vector<1x24x128xf32>
    %61 = vector.shape_cast %60 : vector<1x24x128xf32> to vector<24x128xf32>
    %62 = arith.addf %59, %61 : vector<24x128xf32>
    %cst_60 = arith.constant dense<0.000000e+00> : vector<24xf32>
    %63 = vector.multi_reduction <add>, %62, %cst_60 [1] : vector<24x128xf32> to vector<24xf32>
    %64 = vector.shape_cast %63 : vector<24xf32> to vector<24x1xf32>
    %cst_61 = arith.constant 1.280000e+02 : f32
    %65 = vector.broadcast %cst_61 : f32 to vector<24x1xf32>
    %66 = arith.divf %64, %65 : vector<24x1xf32>
    %67 = vector.broadcast %66 : vector<24x1xf32> to vector<24x128xf32>
    %68 = arith.subf %62, %67 : vector<24x128xf32>
    %69 = arith.mulf %68, %68 : vector<24x128xf32>
    %cst_62 = arith.constant dense<0.000000e+00> : vector<24xf32>
    %70 = vector.multi_reduction <add>, %69, %cst_62 [1] : vector<24x128xf32> to vector<24xf32>
    %71 = vector.shape_cast %70 : vector<24xf32> to vector<24x1xf32>
    %cst_63 = arith.constant 1.280000e+02 : f32
    %72 = vector.broadcast %cst_63 : f32 to vector<24x1xf32>
    %73 = arith.divf %71, %72 : vector<24x1xf32>
    %74 = vector.broadcast %66 : vector<24x1xf32> to vector<24x128xf32>
    %75 = arith.subf %62, %74 : vector<24x128xf32>
    %cst_64 = arith.constant 9.99999974E-6 : f32
    %76 = vector.broadcast %cst_64 : f32 to vector<24x1xf32>
    %77 = arith.addf %73, %76 : vector<24x1xf32>
    %78 = math.rsqrt %77 : vector<24x1xf32>
    %79 = vector.broadcast %78 : vector<24x1xf32> to vector<24x128xf32>
    %80 = arith.mulf %75, %79 : vector<24x128xf32>
    %c0_65 = arith.constant 0 : index
    %c0_66 = arith.constant 0 : index
    %81 = vector.load %arg4[%c0_65, %c0_66] : memref<1x128xf32, #tpu.memory_space<vmem>>, vector<1x128xf32>
    %82 = vector.broadcast %81 : vector<1x128xf32> to vector<24x128xf32>
    %83 = arith.mulf %80, %82 : vector<24x128xf32>
    %c0_67 = arith.constant 0 : index
    %c0_68 = arith.constant 0 : index
    %84 = vector.load %arg5[%c0_67, %c0_68] : memref<1x128xf32, #tpu.memory_space<vmem>>, vector<1x128xf32>
    %85 = vector.broadcast %84 : vector<1x128xf32> to vector<24x128xf32>
    %86 = arith.addf %83, %85 : vector<24x128xf32>
    %c0_69 = arith.constant 0 : index
    %c0_70 = arith.constant 0 : index
    %c0_71 = arith.constant 0 : index
    %87 = vector.load %arg6[%c0_69, %c0_70, %c0_71] : memref<1x24x128xf32, #tpu.memory_space<vmem>>, vector<1x24x128xf32>
    %88 = vector.shape_cast %87 : vector<1x24x128xf32> to vector<24x128xf32>
    %89 = vector.shape_cast %86 : vector<24x128xf32> to vector<1x24x128xf32>
    tpu.vector_store %arg6[%c0_69, %c0_70, %c0_71], %89 {strides = array<i32>} : memref<1x24x128xf32, #tpu.memory_space<vmem>>, vector<1x24x128xf32>,
    return
  }
  func.func @transform_0(%arg0: i32) -> (i32, i32, i32) {
    %c0_i32 = arith.constant 0 : i32
    %c0_i32_0 = arith.constant 0 : i32
    %c0_i32_1 = arith.constant 0 : i32
    return %arg0, %c0_i32, %c0_i32_0 : i32, i32, i32
  }
  func.func @transform_1(%arg0: i32) -> (i32, i32, i32) {
    %c0_i32 = arith.constant 0 : i32
    %c0_i32_0 = arith.constant 0 : i32
    %c0_i32_1 = arith.constant 0 : i32
    %c0_i32_2 = arith.constant 0 : i32
    return %c0_i32, %c0_i32_0, %c0_i32_1 : i32, i32, i32
  }
  func.func @transform_2(%arg0: i32) -> (i32, i32) {
    %c0_i32 = arith.constant 0 : i32
    %c0_i32_0 = arith.constant 0 : i32
    %c0_i32_1 = arith.constant 0 : i32
    return %c0_i32, %c0_i32_0 : i32, i32
  }
  func.func @transform_3(%arg0: i32) -> (i32, i32) {
    %c0_i32 = arith.constant 0 : i32
    %c0_i32_0 = arith.constant 0 : i32
    %c0_i32_1 = arith.constant 0 : i32
    return %c0_i32, %c0_i32_0 : i32, i32
  }
  func.func @transform_4(%arg0: i32) -> (i32, i32) {
    %c0_i32 = arith.constant 0 : i32
    %c0_i32_0 = arith.constant 0 : i32
    %c0_i32_1 = arith.constant 0 : i32
    return %c0_i32, %c0_i32_0 : i32, i32
  }
  func.func @transform_5(%arg0: i32) -> (i32, i32, i32) {
    %c0_i32 = arith.constant 0 : i32
    %c0_i32_0 = arith.constant 0 : i32
    %c0_i32_1 = arith.constant 0 : i32
    return %arg0, %c0_i32, %c0_i32_0 : i32, i32, i32
  }
}

</mosaic_0001>

<bundles_post_ra>
// kernel: tpu_custom_call.1
= control target key start
LH: loop header
LB: loop body
LE: loop exit
PB: predicated region body
PF: predicated region fallthrough
CT: control target
= control target key end

     0   :  { %10 = vsyncpa [#allocation3], 0  ;;  %s2771_s0 = inlined_call_operand.hbm [shape: f32[2,32,128], index: 0, kind: input, shape index: {}]   ;;  %s2772_s1 = inlined_call_operand.hbm [shape: f32[9,128,128], index: 1, kind: input, shape index: {}]   ;;  %s2773_s2 = inlined_call_operand.vmem [shape: f32[1,128], index: 2, kind: input, shape index: {}]   ;;  %s2774_s3 = inlined_call_operand.vmem [shape: f32[1,128], index: 3, kind: input, shape index: {}]   ;;  %s2775_s4 = inlined_call_operand.vmem [shape: f32[1,128], index: 4, kind: input, shape index: {}]   ;;  %s2776_s5 = inlined_call_operand.hbm [shape: f32[2,24,128], index: 5, kind: output, shape index: {}]  }
   0x1   :  { %12 = vsyncpa [#allocation3 + $0x1], 0 }
   0x2   :  { %13 = vsyncpa [#allocation6], 0 }
   0x3   :  { %14 = vsyncpa [#allocation4], 0 }
   0x4   :  { %16 = vsyncpa [#allocation4 + $0x1], 0  ;;  %s2379_s18 = smov 0   ;;  %s2381_s19 = smov 0  }
   0x5   :  { %s2383_s20 = smov 0   ;;  %s2385_s21 = smov 0  }
   0x6 LB: > { %s2400_s22 = sadd.s32 4294967295, %s2337_s21   ;;  %s1348_s23 = sadd.s32 4294967294, %s2337_s21   ;;  %s2337_s21 = sphi %s2385_s21, %s2796_s21   ;;  %s2333_s20 = sphi %s2383_s20, %s2795_s20   ;;  %s2329_s19 = sphi %s2381_s19, %s2794_s19   ;;  %s2325_s18 = sphi %s2379_s18, %s2793_s18  }
   0x7   : > { %p42_p0 = scmp.ne.s32.totalorder %s2329_s19, %s2325_s18  ;;  %p2777_p1 = scmp.eq.s32.totalorder %s2400_s22, 0 }
   0x8   : > { %p156_p3 = scmp.eq.s32.totalorder %s1348_s23, 1  ;;  %p1349_p5 = scmp.ge.s32.totalorder %s2337_s21, 1 }
   0x9   : > { %p2409_p4 = por %p2777_p1, %p42_p0  ;;  %p163_p7 = scmp.lt.s32.totalorder %s2337_s21, 3 }
   0xa   : > { %p2414_p6 = por %p156_p3, %p42_p0  ;;  %s2339_s27 = smov [#allocation5]  }
   0xb   : > { %s2780_s24 = scalar_select %p2409_p4, 1, 0 }
   0xc   : > { %s2781_s25 = scalar_select %p2414_p6, 1, 0 }
   0xd   : > { %p2419_p8 = pnand %p1349_p5, %p163_p7  ;;  %s175_s28 = sshll.u32 %s2339_s27, 4  ;;  %s2423_s28 = int_to_ptr.vmem [resolvable:$true] %s175_s28 }
   0xe   : > { %s2435_s30 = sadd.s32 1, %s2337_s21   ;;  %s29_s6 = sadd.s32 1, %s2333_s20 }
   0xf   : > { %s2782_s26 = scalar_select %p2419_p8, 1, 0 }
  0x10   : > { %p2147_p9 = pneg %p2419_p8  ;;  %s26_s7 = ssub.s32 %s2337_s21, %s2435_s30 }
  0x11   : > { %s2209_s10 = scalar_lea.hbm %s2772_s1, 18432 }
  0x12   : > { %p2430_p11 = pnand %p2147_p9, %p2777_p1  ;;  %p2210_p12 = scmp.ne.s32.totalorder %s2772_s1, %s2209_s10 }
  0x13   : > { %p2216_p5 = scmp.lt.u32.totalorder %s2209_s10, %s2772_s1 }
  0x14   : > { %p2211_p13 = pneg %p2430_p11 }
  0x16   : > { %p2212_p0 = pnand %p2211_p13, %p2210_p12 }
  0x18   : > { %p2213_p3 = pneg %p2212_p0 }
  0x1a   : > { %p2218_p7 = pnand %p2216_p5, %p2213_p3 }
  0x1c   : > { %2221 = shalt.err (!%p2218_p7)
}
  0x1d   : > { %s2222_s15 = scalar_lea.vmem %s2423_s28, 18432  ;;  %p2230_p2 = scmp.lt.s32.totalorder %s2423_s28, %s2423_s28 }
  0x1e   : > { %p2223_p9 = scmp.ne.s32.totalorder %s2423_s28, %s2222_s15  ;;  %p2231_p6 = scmp.lt.s32.totalorder %s2222_s15, %s2222_s15 }
  0x20   : > { %p2225_p10 = pnand %p2223_p9, %p2211_p13  ;;  %p2232_p4 = por %p2231_p6, %p2230_p2 }
  0x22   : > { %p2226_p1 = pneg %p2225_p10 }
  0x24   : > { %p2233_p8 = pnand %p2232_p4, %p2226_p1 }
  0x26   : > { %2236 = shalt.err (!%p2233_p8)
}
  0x27   : > { %s2340_s16 = smov 128   ;;  %s2341_s17 = smov 8  }
  0x28   : > { %2150 = dma.hbm_to_vmem [thread:$0]  (!%p2430_p11), %s2772_s1, 18432, %s2423_s28, [#allocation6], %s2340_s16, %s2340_s16, %s2341_s17  }
  0x29   : > { %p27_p1 = scmp.eq.s32.totalorder %s26_s7, 0  ;;  %p36_p2 = scmp.ne.s32.totalorder %s2333_s20, %s2329_s19 }
  0x2a   : > { %p37_p4 = scmp.eq.s32.totalorder %s2337_s21, 0  ;;  %p2160_p6 = scmp.lt.s32.totalorder %s2337_s21, 2 }
  0x2b   : > { %s2469_s8 = scalar_select %p27_p1, %s2333_s20, %s29_s6  }
  0x2c   : > { %p38_p8 = por %p37_p4, %p36_p2  ;;  %p2784_p10 = scmp.eq.s32.totalorder %s2400_s22, 1 }
  0x2d   : > { %s198_s29 = sand.u32 1, %s2333_s20   ;;  %s1364_s10 = sshll.u32 %s2337_s21, 9 }
  0x2e   : > { %p2473_p12 = por %p2784_p10, %p36_p2  ;;  %s1352_s11 = sshll.u32 %s198_s29, 5 }
  0x2f   : > { %s2482_s14 = scalar_lea.hbm %s2771_s0, %s1364_s10  ;;  %s202_s28 = scalar_lea.vmem [#allocation2], %s1352_s11 }
  0x30   : > { %s209_s6 = sshll.u32 %s202_s28, 4  ;;  %p2484_p11 = pnand %p2160_p6, %p38_p8  ;;  %s2488_s6 = int_to_ptr.vmem [resolvable:$true] %s209_s6 }
  0x31   : > { %s2490_s15 = scalar_lea.sflag [#allocation3], %s198_s29  ;;  %s2237_s23 = scalar_lea.hbm %s2482_s14, 512 }
  0x32   : > { %p2238_p13 = scmp.ne.s32.totalorder %s2482_s14, %s2237_s23  ;;  %p2239_p0 = pneg %p2484_p11 }
  0x33   : > { %s2242_s11 = scalar_lea.hbm %s2771_s0, 1024  ;;  %p2243_p7 = scmp.lt.u32.totalorder %s2482_s14, %s2771_s0 }
  0x34   : > { %p2240_p3 = pnand %p2239_p0, %p2238_p13  ;;  %p2244_p9 = scmp.lt.u32.totalorder %s2242_s11, %s2237_s23 }
  0x35   : > { %p2246_p2 = scmp.lt.u32.totalorder %s2237_s23, %s2482_s14 }
  0x36   : > { %p2241_p5 = pneg %p2240_p3  ;;  %p2245_p1 = por %p2244_p9, %p2243_p7 }
  0x38   : > { %p2247_p4 = por %p2246_p2, %p2245_p1 }
  0x3a   : > { %p2248_p6 = pnand %p2247_p4, %p2241_p5 }
  0x3c   : > { %2251 = shalt.err (!%p2248_p6)
}
  0x3d   : > { %s2252_s29 = scalar_lea.vmem %s2488_s6, 512  ;;  %s2342_s28 = smov [#allocation2]  }
  0x3e   : > { %p2253_p8 = scmp.ne.s32.totalorder %s2488_s6, %s2252_s29  ;;  %s2257_s27 = sshll.u32 %s2342_s28, 4  ;;  %s2258_s27 = int_to_ptr.vmem [resolvable:$false] %s2257_s27 }
  0x3f   : > { %s2259_s10 = scalar_lea.vmem %s2258_s27, 1024  ;;  %p2260_p3 = scmp.lt.s32.totalorder %s2488_s6, %s2258_s27 }
  0x40   : > { %p2255_p10 = pnand %p2253_p8, %p2239_p0  ;;  %p2261_p7 = scmp.lt.s32.totalorder %s2259_s10, %s2252_s29 }
  0x42   : > { %p2256_p13 = pneg %p2255_p10  ;;  %p2262_p9 = por %p2261_p7, %p2260_p3 }
  0x44   : > { %p2263_p1 = pnand %p2262_p9, %p2256_p13 }
  0x46   : > { %2266 = shalt.err (!%p2263_p1)
}
  0x47   : > { %2154 = dma.hbm_to_vmem [thread:$0]  (!%p2484_p11), %s2482_s14, 512, %s2488_s6, %s2490_s15, %s2340_s16, %s2340_s16, %s2341_s17  }
  0x48   : > { %p2787_p0 = scmp.ne.s32.totalorder %s2782_s26, 0 }
  0x49   : > { %s2524_s23 = sand.u32 (!%p2787_p0), 1, %s2329_s19   ;;  %p2788_p5 = scmp.ne.s32.totalorder (!%p2787_p0), %s2780_s24, 0 }
  0x4a   : > { %221 = sbr.rel (%p2787_p0) target bundleno = 798 (0x31e), region = 40  ;;  %s1356_s11 = sshll.u32 (!%p2787_p0), %s2524_s23, 5 }
  0x4b   : > { %s224_s12 = scalar_lea.sflag (!%p2787_p0), [#allocation3], %s2524_s23  ;;  %s2528_s13 = scalar_lea.vmem (!%p2787_p0), [#allocation2], %s1356_s11 }
  0x51   : > { %2312 = dma.done.wait (%p2788_p5), %s224_s12, 512  }
  0x52   : > { %2314 = vsyncadd (%p2788_p5), %s224_s12, 4294966784  ;;  %p2789_p11 = scmp.eq.s32.totalorder %s2400_s22, 0 }
  0x54   : > { %2316 = dma.done.wait (%p2789_p11), [#allocation6], 18432   ;;  %p2790_p2 = pmov %p2789_p11 }
  0x55   : > { %v2343_v0 = vmov 0.0|0.0   ;;  %vm2344_vm0 = vmmov 0   ;;  %v2345_v1 = vmov 0.0   ;;  %v281_v2 = vld [vmem:[#allocation5 + $0x80] sm:$0xff]  ;;  %v282_v3 = vld [vmem:[#allocation5 + $0x88] sm:$0xff]  ;;  %v283_v7 = vld [vmem:[#allocation5 + $0x90] sm:$0xff] }
  0x56   : > { %2318 = vsyncadd (%p2790_p2), [#allocation6], 4294948864  ;;  %1905 = vmatprep.subr.bf16.mxu0 %v2343_v0  ;;  %1929 = vmatprep.subr.bf16.mxu1 %v2343_v0  ;;  %v261_v4 = vld [vmem:[#allocation5] sm:$0xff]  ;;  %v1906_v5 = vpack.c.bf16 %v282_v3, %v281_v2  ;;  %v262_v6 = vld [vmem:[#allocation5 + $0x8] sm:$0xff]  ;;  %s2137_s14 = smul.u32 24, %s2524_s23 }
  0x57   : > { %1568 = vmatprep.mubr.msk.f32.mxu0 %vm2344_vm0, %v2345_v1  ;;  %1609 = vmatprep.mubr.msk.f32.mxu1 %vm2344_vm0, %v2345_v1  ;;  %v284_v8 = vld [vmem:[#allocation5 + $0x98] sm:$0xff]  ;;  %v1930_v9 = vpack.c.bf16 %v262_v6, %v261_v4  ;;  %v263_v10 = vld [vmem:[#allocation5 + $0x10] sm:$0xff]  ;;  %v285_v14 = vld [vmem:[#allocation5 + $0xa0] sm:$0xff]  ;;  %s2138_s15 = smul.u32 384, %s2400_s22  ;;  %s1252_s22 = scalar_lea.sflag [#allocation4], %s2524_s23 }
  0x58   : > { %v264_v11 = vld [vmem:[#allocation5 + $0x18] sm:$0xff]  ;;  %1907 = vmatpush3.bf16.msra.mxu0 %v1906_v5  ;;  %v1909_v12 = vpack.c.bf16 %v284_v8, %v283_v7  ;;  %v286_v15 = vld [vmem:[#allocation5 + $0xa8] sm:$0xff]  ;;  %v265_v16 = vld [vmem:[#allocation5 + $0x20] sm:$0xff]  ;;  %s257_s29 = scalar_lea.vmem [#allocation7], %s2137_s14 }
  0x59   : > { %1931 = vmatpush3.bf16.msra.mxu1 %v1930_v9  ;;  %1908 = vmatprep.subr.bf16.mxu0 %v2343_v0  ;;  %v1933_v13 = vpack.c.bf16 %v264_v11, %v263_v10  ;;  %v266_v17 = vld [vmem:[#allocation5 + $0x28] sm:$0xff]  ;;  %v1912_v18 = vpack.c.bf16 %v286_v15, %v285_v14  ;;  %v287_v20 = vld [vmem:[#allocation5 + $0xb0] sm:$0xff]  ;;  %v288_v21 = vld [vmem:[#allocation5 + $0xb8] sm:$0xff]  ;;  %s1265_s28 = sshll.u32 %s257_s29, 4  ;;  %s2725_s11 = scalar_lea.hbm %s2776_s5, %s2138_s15  ;;  %s2727_s28 = int_to_ptr.vmem [resolvable:$true] %s1265_s28 }
  0x5a   : > { %1932 = vmatprep.subr.bf16.mxu1 %v2343_v0  ;;  %v1936_v19 = vpack.c.bf16 %v266_v17, %v265_v16  ;;  %v267_v22 = vld [vmem:[#allocation5 + $0x30] sm:$0xff]  ;;  %v268_v23 = vld [vmem:[#allocation5 + $0x38] sm:$0xff]  ;;  %v1915_v24 = vpack.c.bf16 %v288_v21, %v287_v20  ;;  %v289_v26 = vld [vmem:[#allocation5 + $0xc0] sm:$0xff]  ;;  %s2267_s12 = scalar_lea.vmem %s2727_s28, 384 }
  0x5b   : > { %v1939_v25 = vpack.c.bf16 %v268_v23, %v267_v22  ;;  %v290_v27 = vld [vmem:[#allocation5 + $0xc8] sm:$0xff]  ;;  %v269_v28 = vld [vmem:[#allocation5 + $0x40] sm:$0xff]  ;;  %v291_v32 = vld [vmem:[#allocation5 + $0xd0] sm:$0xff]  ;;  %p2268_p4 = scmp.ne.s32.totalorder %s2727_s28, %s2267_s12 }
  0x5c   : > { %1910 = vmatpush3.bf16.msra.mxu0 %v1909_v12  ;;  %v270_v29 = vld [vmem:[#allocation5 + $0x48] sm:$0xff]  ;;  %v1918_v30 = vpack.c.bf16 %v290_v27, %v289_v26  ;;  %v292_v33 = vld [vmem:[#allocation5 + $0xd8] sm:$0xff]  ;;  %v271_v34 = vld [vmem:[#allocation5 + $0x50] sm:$0xff] }
  0x5d   : > { %1934 = vmatpush3.bf16.msra.mxu1 %v1933_v13  ;;  %1911 = vmatprep.subr.bf16.mxu0 %v2343_v0  ;;  %v1942_v31 = vpack.c.bf16 %v270_v29, %v269_v28  ;;  %v272_v35 = vld [vmem:[#allocation5 + $0x58] sm:$0xff]  ;;  %v1921_v36 = vpack.c.bf16 %v292_v33, %v291_v32  ;;  %v293_v38 = vld [vmem:[#allocation5 + $0xe0] sm:$0xff]  ;;  %v294_v39 = vld [vmem:[#allocation5 + $0xe8] sm:$0xff]  ;;  %p2269_p6 = pnand %p2268_p4, %p2473_p12 }
  0x5e   : > { %1935 = vmatprep.subr.bf16.mxu1 %v2343_v0  ;;  %v1945_v37 = vpack.c.bf16 %v272_v35, %v271_v34  ;;  %v273_v40 = vld [vmem:[#allocation5 + $0x60] sm:$0xff]  ;;  %v274_v41 = vld [vmem:[#allocation5 + $0x68] sm:$0xff]  ;;  %v1924_v42 = vpack.c.bf16 %v294_v39, %v293_v38  ;;  %v295_v44 = vld [vmem:[#allocation5 + $0xf0] sm:$0xff] }
  0x5f   : > { %v1948_v43 = vpack.c.bf16 %v274_v41, %v273_v40  ;;  %v296_v45 = vld [vmem:[#allocation5 + $0xf8] sm:$0xff]  ;;  %v275_v46 = vld [vmem:[#allocation5 + $0x70] sm:$0xff]  ;;  %v461_v50 = vld [vmem:[#allocation5 + $0x100] sm:$0xff]  ;;  %p2270_p8 = pneg %p2269_p6 }
  0x60   : > { %1913 = vmatpush3.bf16.msra.mxu0 %v1912_v18  ;;  %v276_v47 = vld [vmem:[#allocation5 + $0x78] sm:$0xff]  ;;  %v1927_v48 = vpack.c.bf16 %v296_v45, %v295_v44  ;;  %v462_v51 = vld [vmem:[#allocation5 + $0x108] sm:$0xff]  ;;  %v564_v52 = vld [vmem:[#allocation5 + $0x180] sm:$0xff] }
  0x61   : > { %1937 = vmatpush3.bf16.msra.mxu1 %v1936_v19  ;;  %1914 = vmatprep.subr.bf16.mxu0 %v2343_v0  ;;  %v1951_v49 = vpack.c.bf16 %v276_v47, %v275_v46  ;;  %v565_v53 = vld [vmem:[#allocation5 + $0x188] sm:$0xff]  ;;  %v1954_v55 = vpack.c.bf16 %v462_v51, %v461_v50  ;;  %v258_v56 = vld [vmem:[%s2528_s13] sm:$0xff]  ;;  %v463_v58 = vld [vmem:[#allocation5 + $0x110] sm:$0xff] }
  0x62   : > { %1938 = vmatprep.subr.bf16.mxu1 %v2343_v0  ;;  %v277_v54 = vld [vmem:[%s2528_s13 + $0x1] sm:$0xff]  ;;  %v1978_v57 = vpack.c.bf16 %v565_v53, %v564_v52  ;;  %v464_v59 = vld [vmem:[#allocation5 + $0x118] sm:$0xff]  ;;  %v566_v60 = vld [vmem:[#allocation5 + $0x190] sm:$0xff] }
  0x63   : > { %v567_v61 = vld [vmem:[#allocation5 + $0x198] sm:$0xff]  ;;  %v1957_v62 = vpack.c.bf16 %v464_v59, %v463_v58  ;;  %v278_v63 = vld [vmem:[%s2528_s13 + $0x9] sm:$0xff]  ;;  %v465_v3 = vld [vmem:[#allocation5 + $0x120] sm:$0xff] }
  0x64   : > { %1916 = vmatpush3.bf16.msra.mxu0 %v1915_v24  ;;  %v1981_v2 = vpack.c.bf16 %v567_v61, %v566_v60  ;;  %v466_v4 = vld [vmem:[#allocation5 + $0x128] sm:$0xff]  ;;  %v568_v6 = vld [vmem:[#allocation5 + $0x1a0] sm:$0xff]  ;;  %v279_v9 = vld [vmem:[%s2528_s13 + $0x11] sm:$0xff] }
  0x65   : > { %1940 = vmatpush3.bf16.msra.mxu1 %v1939_v25  ;;  %1917 = vmatprep.subr.bf16.mxu0 %v2343_v0  ;;  %v2565_v5 = vld [vmem:[%s2528_s13 + $0x8] sm:$0xff]  ;;  %v1960_v8 = vpack.c.bf16 %v466_v4, %v465_v3  ;;  %v467_v11 = vld [vmem:[#allocation5 + $0x130] sm:$0xff]  ;;  %v468_v12 = vld [vmem:[#allocation5 + $0x138] sm:$0xff] }
  0x66   : > { %1941 = vmatprep.subr.bf16.mxu1 %v2343_v0  ;;  %v569_v7 = vld [vmem:[#allocation5 + $0x1a8] sm:$0xff]  ;;  %v2576_v13 = vld [vmem:[%s2528_s13 + $0x10] sm:$0xff]  ;;  %v571_v15 = vld [vmem:[#allocation5 + $0x1b8] sm:$0xff]  ;;  %v1963_v16 = vpack.c.bf16 %v468_v12, %v467_v11 }
  0x67   : > { %v1984_v10 = vpack.c.bf16 %v569_v7, %v568_v6  ;;  %v570_v14 = vld [vmem:[#allocation5 + $0x1b0] sm:$0xff]  ;;  %v469_v18 = vld [vmem:[#allocation5 + $0x140] sm:$0xff]  ;;  %v470_v19 = vld [vmem:[#allocation5 + $0x148] sm:$0xff] }
  0x68   : > { %1919 = vmatpush3.bf16.msra.mxu0 %v1918_v30  ;;  %v1987_v17 = vpack.c.bf16 %v571_v15, %v570_v14  ;;  %v572_v20 = vld [vmem:[#allocation5 + $0x1c0] sm:$0xff]  ;;  %v573_v21 = vld [vmem:[#allocation5 + $0x1c8] sm:$0xff]  ;;  %v1966_v22 = vpack.c.bf16 %v470_v19, %v469_v18  ;;  %v471_v24 = vld [vmem:[#allocation5 + $0x150] sm:$0xff] }
  0x69   : > { %1943 = vmatpush3.bf16.msra.mxu1 %v1942_v31  ;;  %1920 = vmatprep.subr.bf16.mxu0 %v2343_v0  ;;  %v1990_v23 = vpack.c.bf16 %v573_v21, %v572_v20  ;;  %v472_v25 = vld [vmem:[#allocation5 + $0x158] sm:$0xff]  ;;  %v574_v26 = vld [vmem:[#allocation5 + $0x1d0] sm:$0xff]  ;;  %v473_v30 = vld [vmem:[#allocation5 + $0x160] sm:$0xff] }
  0x6a   : > { %1944 = vmatprep.subr.bf16.mxu1 %v2343_v0  ;;  %v575_v27 = vld [vmem:[#allocation5 + $0x1d8] sm:$0xff]  ;;  %v1969_v28 = vpack.c.bf16 %v472_v25, %v471_v24  ;;  %v474_v31 = vld [vmem:[#allocation5 + $0x168] sm:$0xff]  ;;  %v576_v32 = vld [vmem:[#allocation5 + $0x1e0] sm:$0xff] }
  0x6b   : > { %v1993_v29 = vpack.c.bf16 %v575_v27, %v574_v26  ;;  %v577_v33 = vld [vmem:[#allocation5 + $0x1e8] sm:$0xff]  ;;  %v1972_v34 = vpack.c.bf16 %v474_v31, %v473_v30  ;;  %v578_v38 = vld [vmem:[#allocation5 + $0x1f0] sm:$0xff]  ;;  %v579_v39 = vld [vmem:[#allocation5 + $0x1f8] sm:$0xff] }
  0x6c   : > { %1922 = vmatpush3.bf16.msra.mxu0 %v1921_v36  ;;  %v1996_v35 = vpack.c.bf16 %v577_v33, %v576_v32  ;;  %v475_v36 = vld [vmem:[#allocation5 + $0x170] sm:$0xff]  ;;  %v1999_v41 = vpack.c.bf16 %v579_v39, %v578_v38  ;;  %v770_v44 = vld [vmem:[#allocation5 + $0x280] sm:$0xff]  ;;  %v771_v45 = vld [vmem:[#allocation5 + $0x288] sm:$0xff] }
  0x6d   : > { %1946 = vmatpush3.bf16.msra.mxu1 %v1945_v37  ;;  %1923 = vmatprep.subr.bf16.mxu0 %v2343_v0  ;;  %v476_v37 = vld [vmem:[#allocation5 + $0x178] sm:$0xff]  ;;  %v457_v46 = vld [vmem:[%s2528_s13 + $0x2] sm:$0xff]  ;;  %v669_v50 = vld [vmem:[#allocation5 + $0x210] sm:$0xff] }
  0x6e   : > { %1947 = vmatprep.subr.bf16.mxu1 %v2343_v0  ;;  %v1975_v40 = vpack.c.bf16 %v476_v37, %v475_v36  ;;  %v670_v51 = vld [vmem:[#allocation5 + $0x218] sm:$0xff]  ;;  %v772_v52 = vld [vmem:[#allocation5 + $0x290] sm:$0xff]  ;;  %v671_v58 = vld [vmem:[#allocation5 + $0x220] sm:$0xff] }
  0x6f   : > { %v773_v53 = vld [vmem:[#allocation5 + $0x298] sm:$0xff]  ;;  %v672_v59 = vld [vmem:[#allocation5 + $0x228] sm:$0xff]  ;;  %v774_v60 = vld [vmem:[#allocation5 + $0x2a0] sm:$0xff] }
  0x70   : > { %1925 = vmatpush3.bf16.msra.mxu0 %v1924_v42  ;;  %v667_v42 = vld [vmem:[#allocation5 + $0x200] sm:$0xff]  ;;  %v775_v61 = vld [vmem:[#allocation5 + $0x2a8] sm:$0xff]  ;;  %v562_v3 = vld [vmem:[%s2528_s13 + $0x13] sm:$0xff] }
  0x71   : > { %1949 = vmatpush3.bf16.msra.mxu1 %v1948_v43  ;;  %1926 = vmatprep.subr.bf16.mxu0 %v2343_v0  ;;  %v668_v43 = vld [vmem:[#allocation5 + $0x208] sm:$0xff]  ;;  %v673_v4 = vld [vmem:[#allocation5 + $0x230] sm:$0xff]  ;;  %v674_v6 = vld [vmem:[#allocation5 + $0x238] sm:$0xff] }
  0x72   : > { %1950 = vmatprep.subr.bf16.mxu1 %v2343_v0  ;;  %v2002_v47 = vpack.c.bf16 %v668_v43, %v667_v42  ;;  %v776_v7 = vld [vmem:[#allocation5 + $0x2b0] sm:$0xff]  ;;  %v675_v11 = vld [vmem:[#allocation5 + $0x240] sm:$0xff]  ;;  %v676_v12 = vld [vmem:[#allocation5 + $0x248] sm:$0xff] }
  0x73   : > { %v778_v14 = vld [vmem:[#allocation5 + $0x2c0] sm:$0xff]  ;;  %v779_v15 = vld [vmem:[#allocation5 + $0x2c8] sm:$0xff]  ;;  %v677_v18 = vld [vmem:[#allocation5 + $0x250] sm:$0xff] }
  0x74   : > { %1928 = vmatpush3.bf16.msra.mxu0 %v1927_v48  ;;  %v560_v48 = vld [vmem:[%s2528_s13 + $0x3] sm:$0xff]  ;;  %v678_v19 = vld [vmem:[#allocation5 + $0x258] sm:$0xff]  ;;  %v780_v20 = vld [vmem:[#allocation5 + $0x2d0] sm:$0xff] }
  0x75   : > { %1952 = vmatpush3.bf16.msra.mxu1 %v1951_v49  ;;  %1953 = vmatprep.subr.bf16.mxu0 %v2343_v0  ;;  %v2026_v49 = vpack.c.bf16 %v771_v45, %v770_v44  ;;  %v781_v21 = vld [vmem:[#allocation5 + $0x2d8] sm:$0xff]  ;;  %v679_v24 = vld [vmem:[#allocation5 + $0x260] sm:$0xff]  ;;  %v680_v25 = vld [vmem:[#allocation5 + $0x268] sm:$0xff] }
  0x76   : > { %1977 = vmatprep.subr.bf16.mxu1 %v2343_v0  ;;  %v782_v26 = vld [vmem:[#allocation5 + $0x2e0] sm:$0xff]  ;;  %v783_v27 = vld [vmem:[#allocation5 + $0x2e8] sm:$0xff]  ;;  %v681_v30 = vld [vmem:[#allocation5 + $0x270] sm:$0xff] }
  0x77   : > { %1569 = vmatmul.mubr.f32.vlgmr.msra.gmra.mrb[0].mxu0 %v277_v54  ;;  %v458_v54 = vld [vmem:[%s2528_s13 + $0xa] sm:$0xff]  ;;  %v682_v31 = vld [vmem:[#allocation5 + $0x278] sm:$0xff]  ;;  %v873_v36 = vld [vmem:[#allocation5 + $0x300] sm:$0xff] }
  0x78   : > { %1610 = vmatmul.mubr.f32.vlgmr.msra.gmra.mrb[0].mxu1 %v258_v56  ;;  %1955 = vmatpush3.bf16.msra.mxu0 %v1954_v55  ;;  %v2005_v55 = vpack.c.bf16 %v670_v51, %v669_v50  ;;  %v2029_v56 = vpack.c.bf16 %v773_v53, %v772_v52  ;;  %v784_v32 = vld [vmem:[#allocation5 + $0x2f0] sm:$0xff]  ;;  %v785_v33 = vld [vmem:[#allocation5 + $0x2f8] sm:$0xff]  ;;  %v874_v37 = vld [vmem:[#allocation5 + $0x308] sm:$0xff] }
  0x79   : > { %1979 = vmatpush3.bf16.msra.mxu1 %v1978_v57  ;;  %1956 = vmatprep.subr.bf16.mxu0 %v2343_v0  ;;  %v561_v57 = vld [vmem:[%s2528_s13 + $0xb] sm:$0xff]  ;;  %v976_v38 = vld [vmem:[#allocation5 + $0x380] sm:$0xff]  ;;  %v876_v45 = vld [vmem:[#allocation5 + $0x318] sm:$0xff] }
  0x7a   : > { %1980 = vmatprep.subr.bf16.mxu1 %v2343_v0  ;;  %1571 = vmatprep.mubr.msk.f32.mxu0 %vm2344_vm0, %v2345_v1  ;;  %v977_v39 = vld [vmem:[#allocation5 + $0x388] sm:$0xff]  ;;  %v875_v44 = vld [vmem:[#allocation5 + $0x310] sm:$0xff]  ;;  %v877_v52 = vld [vmem:[#allocation5 + $0x320] sm:$0xff] }
  0x7b   : > { %1612 = vmatprep.mubr.msk.f32.mxu1 %vm2344_vm0, %v2345_v1  ;;  %1572 = vmatmul.mubr.f32.gmra.mrb[2].mxu0 %v278_v63  ;;  %v2008_v63 = vpack.c.bf16 %v672_v59, %v671_v58  ;;  %v766_v42 = vld [vmem:[%s2528_s13 + $0x5] sm:$0xff]  ;;  %v2074_v43 = vpack.c.bf16 %v977_v39, %v976_v38  ;;  %v767_v51 = vld [vmem:[%s2528_s13 + $0xd] sm:$0xff]  ;;  %v768_v59 = vld [vmem:[%s2528_s13 + $0x15] sm:$0xff] }
  0x7c   : > { %1958 = vmatpush3.bf16.msra.mxu0 %v1957_v62  ;;  %1613 = vmatmul.mubr.f32.gmra.mrb[2].mxu1 %v2565_v5  ;;  %v459_v62 = vld [vmem:[%s2528_s13 + $0x12] sm:$0xff]  ;;  %v878_v53 = vld [vmem:[#allocation5 + $0x328] sm:$0xff] }
  0x7d   : > { %1982 = vmatpush3.bf16.msra.mxu1 %v1981_v2  ;;  %1959 = vmatprep.subr.bf16.mxu0 %v2343_v0  ;;  %v2032_v2 = vpack.c.bf16 %v775_v61, %v774_v60  ;;  %v879_v60 = vld [vmem:[#allocation5 + $0x330] sm:$0xff]  ;;  %v880_v61 = vld [vmem:[#allocation5 + $0x338] sm:$0xff] }
  0x7e   : > { %1983 = vmatprep.subr.bf16.mxu1 %v2343_v0  ;;  %1574 = vmatprep.mubr.msk.f32.mxu0 %vm2344_vm0, %v2345_v1  ;;  %v973_v39 = vld [vmem:[%s2528_s13 + $0xf] sm:$0xff] }
  0x7f   : > { %1615 = vmatprep.mubr.msk.f32.mxu1 %vm2344_vm0, %v2345_v1  ;;  %1575 = vmatmul.mubr.f32.gmra.mrb[4].mxu0 %v279_v9  ;;  %v2011_v9 = vpack.c.bf16 %v674_v6, %v673_v4  ;;  %v881_v4 = vld [vmem:[#allocation5 + $0x340] sm:$0xff]  ;;  %v882_v6 = vld [vmem:[#allocation5 + $0x348] sm:$0xff] }
  0x80   : > { %1961 = vmatpush3.bf16.msra.mxu0 %v1960_v8  ;;  %1616 = vmatmul.mubr.f32.gmra.mrb[4].mxu1 %v2576_v13  ;;  %v777_v8 = vld [vmem:[#allocation5 + $0x2b8] sm:$0xff] }
  0x81   : > { %1985 = vmatpush3.bf16.msra.mxu1 %v1984_v10  ;;  %1962 = vmatprep.subr.bf16.mxu0 %v2343_v0  ;;  %v2035_v10 = vpack.c.bf16 %v777_v8, %v776_v7  ;;  %v984_v7 = vld [vmem:[#allocation5 + $0x3c0] sm:$0xff]  ;;  %v985_v8 = vld [vmem:[#allocation5 + $0x3c8] sm:$0xff] }
  0x82   : > { %1986 = vmatprep.subr.bf16.mxu1 %v2343_v0  ;;  %1650 = vmatprep.mubr.msk.f32.mxu0 %vm2344_vm0, %v2345_v1 }
  0x83   : > { %1691 = vmatprep.mubr.msk.f32.mxu1 %vm2344_vm0, %v2345_v1 }
  0x84   : > { %1964 = vmatpush3.bf16.msra.mxu0 %v1963_v16  ;;  %v2014_v16 = vpack.c.bf16 %v676_v12, %v675_v11  ;;  %v883_v11 = vld [vmem:[#allocation5 + $0x350] sm:$0xff]  ;;  %v884_v12 = vld [vmem:[#allocation5 + $0x358] sm:$0xff] }
  0x85   : > { %1988 = vmatpush3.bf16.msra.mxu1 %v1987_v17  ;;  %1965 = vmatprep.subr.bf16.mxu0 %v2343_v0  ;;  %v2038_v17 = vpack.c.bf16 %v779_v15, %v778_v14  ;;  %v986_v14 = vld [vmem:[#allocation5 + $0x3d0] sm:$0xff]  ;;  %v987_v15 = vld [vmem:[#allocation5 + $0x3d8] sm:$0xff] }
  0x86   : > { %1989 = vmatprep.subr.bf16.mxu1 %v2343_v0 }
  0x88   : > { %1967 = vmatpush3.bf16.msra.mxu0 %v1966_v22  ;;  %v2017_v22 = vpack.c.bf16 %v678_v19, %v677_v18  ;;  %v885_v18 = vld [vmem:[#allocation5 + $0x360] sm:$0xff]  ;;  %v886_v19 = vld [vmem:[#allocation5 + $0x368] sm:$0xff] }
  0x89   : > { %1991 = vmatpush3.bf16.msra.mxu1 %v1990_v23  ;;  %1968 = vmatprep.subr.bf16.mxu0 %v2343_v0  ;;  %v2041_v23 = vpack.c.bf16 %v781_v21, %v780_v20  ;;  %v988_v20 = vld [vmem:[#allocation5 + $0x3e0] sm:$0xff]  ;;  %v989_v21 = vld [vmem:[#allocation5 + $0x3e8] sm:$0xff] }
  0x8a   : > { %1992 = vmatprep.subr.bf16.mxu1 %v2343_v0 }
  0x8c   : > { %1970 = vmatpush3.bf16.msra.mxu0 %v1969_v28  ;;  %v2020_v28 = vpack.c.bf16 %v680_v25, %v679_v24  ;;  %v887_v24 = vld [vmem:[#allocation5 + $0x370] sm:$0xff]  ;;  %v888_v25 = vld [vmem:[#allocation5 + $0x378] sm:$0xff] }
  0x8d   : > { %1994 = vmatpush3.bf16.msra.mxu1 %v1993_v29  ;;  %1971 = vmatprep.subr.bf16.mxu0 %v2343_v0  ;;  %v2044_v29 = vpack.c.bf16 %v783_v27, %v782_v26  ;;  %v990_v26 = vld [vmem:[#allocation5 + $0x3f0] sm:$0xff]  ;;  %v991_v27 = vld [vmem:[#allocation5 + $0x3f8] sm:$0xff] }
  0x8e   : > { %1995 = vmatprep.subr.bf16.mxu1 %v2343_v0 }
  0x90   : > { %1973 = vmatpush3.bf16.msra.mxu0 %v1972_v34  ;;  %v2023_v34 = vpack.c.bf16 %v682_v31, %v681_v30  ;;  %v1079_v30 = vld [vmem:[#allocation5 + $0x400] sm:$0xff]  ;;  %v1080_v31 = vld [vmem:[#allocation5 + $0x408] sm:$0xff] }
  0x91   : > { %1997 = vmatpush3.bf16.msra.mxu1 %v1996_v35  ;;  %1974 = vmatprep.subr.bf16.mxu0 %v2343_v0  ;;  %v2047_v35 = vpack.c.bf16 %v785_v33, %v784_v32  ;;  %v869_v32 = vld [vmem:[%s2528_s13 + $0x6] sm:$0xff]  ;;  %v2098_v33 = vpack.c.bf16 %v1080_v31, %v1079_v30 }
  0x92   : > { %1998 = vmatprep.subr.bf16.mxu1 %v2343_v0 }
  0x94   : > { %1976 = vmatpush3.bf16.msra.mxu0 %v1975_v40  ;;  %v663_v40 = vld [vmem:[%s2528_s13 + $0x4] sm:$0xff] }
  0x95   : > { %2000 = vmatpush3.bf16.msra.mxu1 %v1999_v41  ;;  %2001 = vmatprep.subr.bf16.mxu0 %v2343_v0  ;;  %v2050_v41 = vpack.c.bf16 %v874_v37, %v873_v36  ;;  %v1082_v36 = vld [vmem:[#allocation5 + $0x418] sm:$0xff]  ;;  %v870_v37 = vld [vmem:[%s2528_s13 + $0xe] sm:$0xff] }
  0x96   : > { %2025 = vmatprep.subr.bf16.mxu1 %v2343_v0 }
  0x97   : > { %1651 = vmatmul.mubr.f32.vlgmr.msra.gmra.mrb[6].mxu0 %v457_v46  ;;  %v978_v46 = vld [vmem:[#allocation5 + $0x390] sm:$0xff] }
  0x98   : > { %1692 = vmatmul.mubr.f32.vlgmr.msra.gmra.mrb[6].mxu1 %v560_v48  ;;  %2003 = vmatpush3.bf16.msra.mxu0 %v2002_v47  ;;  %v979_v47 = vld [vmem:[#allocation5 + $0x398] sm:$0xff]  ;;  %v664_v48 = vld [vmem:[%s2528_s13 + $0xc] sm:$0xff] }
  0x99   : > { %2027 = vmatpush3.bf16.msra.mxu1 %v2026_v49  ;;  %1653 = vmatprep.mubr.msk.f32.mxu0 %vm2344_vm0, %v2345_v1  ;;  %v2053_v49 = vpack.c.bf16 %v876_v45, %v875_v44  ;;  %v2077_v50 = vpack.c.bf16 %v979_v47, %v978_v46  ;;  %v974_v44 = vld [vmem:[%s2528_s13 + $0x17] sm:$0xff] }
  0x9a   : > { %2004 = vmatprep.subr.bf16.mxu0 %v2343_v0  ;;  %2028 = vmatprep.subr.bf16.mxu1 %v2343_v0  ;;  %v1085_v45 = vld [vmem:[#allocation5 + $0x430] sm:$0xff]  ;;  %v1086_v46 = vld [vmem:[#allocation5 + $0x438] sm:$0xff] }
  0x9b   : > { %1654 = vmatmul.mubr.f32.gmra.mrb[8].mxu0 %v458_v54  ;;  %1694 = vmatprep.mubr.msk.f32.mxu1 %vm2344_vm0, %v2345_v1  ;;  %v980_v54 = vld [vmem:[#allocation5 + $0x3a0] sm:$0xff]  ;;  %v2107_v47 = vpack.c.bf16 %v1086_v46, %v1085_v45 }
  0x9c   : > { %2006 = vmatpush3.bf16.msra.mxu0 %v2005_v55  ;;  %1695 = vmatmul.mubr.f32.gmra.mrb[8].mxu1 %v561_v57  ;;  %v981_v55 = vld [vmem:[#allocation5 + $0x3a8] sm:$0xff]  ;;  %v2056_v57 = vpack.c.bf16 %v878_v53, %v877_v52  ;;  %v1090_v52 = vld [vmem:[#allocation5 + $0x458] sm:$0xff] }
  0x9d   : > { %2030 = vmatpush3.bf16.msra.mxu1 %v2029_v56  ;;  %1656 = vmatprep.mubr.msk.f32.mxu0 %vm2344_vm0, %v2345_v1  ;;  %v665_v56 = vld [vmem:[%s2528_s13 + $0x14] sm:$0xff]  ;;  %v2080_v58 = vpack.c.bf16 %v981_v55, %v980_v54  ;;  %v1091_v54 = vld [vmem:[#allocation5 + $0x460] sm:$0xff]  ;;  %v1092_v55 = vld [vmem:[#allocation5 + $0x468] sm:$0xff] }
  0x9e   : > { %2007 = vmatprep.subr.bf16.mxu0 %v2343_v0  ;;  %2031 = vmatprep.subr.bf16.mxu1 %v2343_v0 }
  0x9f   : > { %1657 = vmatmul.mubr.f32.gmra.mrb[10].mxu0 %v459_v62  ;;  %1697 = vmatprep.mubr.msk.f32.mxu1 %vm2344_vm0, %v2345_v1  ;;  %v982_v62 = vld [vmem:[#allocation5 + $0x3b0] sm:$0xff] }
  0xa0   : > { %2009 = vmatpush3.bf16.msra.mxu0 %v2008_v63  ;;  %1698 = vmatmul.mubr.f32.gmra.mrb[10].mxu1 %v562_v3  ;;  %v983_v63 = vld [vmem:[#allocation5 + $0x3b8] sm:$0xff] }
  0xa1   : > { %2033 = vmatpush3.bf16.msra.mxu1 %v2032_v2  ;;  %2010 = vmatprep.subr.bf16.mxu0 %v2343_v0  ;;  %v2059_v2 = vpack.c.bf16 %v880_v61, %v879_v60  ;;  %v2083_v3 = vpack.c.bf16 %v983_v63, %v982_v62  ;;  %v2705_v60 = vld [vmem:[%s2528_s13 + $0x18] sm:$0xff] }
  0xa2   : > { %2034 = vmatprep.subr.bf16.mxu1 %v2343_v0  ;;  %1732 = vmatprep.mubr.msk.f32.mxu0 %vm2344_vm0, %v2345_v1 }
  0xa3   : > { %1773 = vmatprep.mubr.msk.f32.mxu1 %vm2344_vm0, %v2345_v1 }
  0xa4   : > { %2012 = vmatpush3.bf16.msra.mxu0 %v2011_v9  ;;  %v2062_v9 = vpack.c.bf16 %v882_v6, %v881_v4 }
  0xa5   : > { %2036 = vmatpush3.bf16.msra.mxu1 %v2035_v10  ;;  %2013 = vmatprep.subr.bf16.mxu0 %v2343_v0  ;;  %v2086_v10 = vpack.c.bf16 %v985_v8, %v984_v7 }
  0xa6   : > { %2037 = vmatprep.subr.bf16.mxu1 %v2343_v0 }
  0xa8   : > { %2015 = vmatpush3.bf16.msra.mxu0 %v2014_v16  ;;  %v2065_v16 = vpack.c.bf16 %v884_v12, %v883_v11 }
  0xa9   : > { %2039 = vmatpush3.bf16.msra.mxu1 %v2038_v17  ;;  %2016 = vmatprep.subr.bf16.mxu0 %v2343_v0  ;;  %v2089_v17 = vpack.c.bf16 %v987_v15, %v986_v14 }
  0xaa   : > { %2040 = vmatprep.subr.bf16.mxu1 %v2343_v0 }
  0xac   : > { %2018 = vmatpush3.bf16.msra.mxu0 %v2017_v22  ;;  %v2068_v22 = vpack.c.bf16 %v886_v19, %v885_v18 }
  0xad   : > { %2042 = vmatpush3.bf16.msra.mxu1 %v2041_v23  ;;  %2019 = vmatprep.subr.bf16.mxu0 %v2343_v0  ;;  %v2092_v23 = vpack.c.bf16 %v989_v21, %v988_v20 }
  0xae   : > { %2043 = vmatprep.subr.bf16.mxu1 %v2343_v0 }
  0xb0   : > { %2021 = vmatpush3.bf16.msra.mxu0 %v2020_v28  ;;  %v2071_v28 = vpack.c.bf16 %v888_v25, %v887_v24 }
  0xb1   : > { %2045 = vmatpush3.bf16.msra.mxu1 %v2044_v29  ;;  %2022 = vmatprep.subr.bf16.mxu0 %v2343_v0  ;;  %v2095_v29 = vpack.c.bf16 %v991_v27, %v990_v26 }
  0xb2   : > { %2046 = vmatprep.subr.bf16.mxu1 %v2343_v0 }
  0xb4   : > { %2024 = vmatpush3.bf16.msra.mxu0 %v2023_v34  ;;  %v972_v34 = vld [vmem:[%s2528_s13 + $0x7] sm:$0xff] }
  0xb5   : > { %2048 = vmatpush3.bf16.msra.mxu1 %v2047_v35  ;;  %2049 = vmatprep.subr.bf16.mxu0 %v2343_v0  ;;  %v1081_v35 = vld [vmem:[#allocation5 + $0x410] sm:$0xff] }
  0xb6   : > { %2073 = vmatprep.subr.bf16.mxu1 %v2343_v0  ;;  %v2101_v38 = vpack.c.bf16 %v1082_v36, %v1081_v35 }
  0xb7   : > { %1733 = vmatmul.mubr.f32.vlgmr.msra.gmra.mrb[12].mxu0 %v663_v40  ;;  %v1083_v40 = vld [vmem:[#allocation5 + $0x420] sm:$0xff] }
  0xb8   : > { %1774 = vmatmul.mubr.f32.vlgmr.msra.gmra.mrb[12].mxu1 %v766_v42  ;;  %2051 = vmatpush3.bf16.msra.mxu0 %v2050_v41  ;;  %v1084_v41 = vld [vmem:[#allocation5 + $0x428] sm:$0xff]  ;;  %v871_v42 = vld [vmem:[%s2528_s13 + $0x16] sm:$0xff]  ;;  %s2346_s13 = smov [#allocation7]  }
  0xb9   : > { %2075 = vmatpush3.bf16.msra.mxu1 %v2074_v43  ;;  %1735 = vmatprep.mubr.msk.f32.mxu0 %vm2344_vm0, %v2345_v1  ;;  %v2104_v43 = vpack.c.bf16 %v1084_v41, %v1083_v40  ;;  %s2271_s24 = sshll.u32 %s2346_s13, 4  ;;  %s2272_s24 = int_to_ptr.vmem [resolvable:$false] %s2271_s24 }
  0xba   : > { %2052 = vmatprep.subr.bf16.mxu0 %v2343_v0  ;;  %2076 = vmatprep.subr.bf16.mxu1 %v2343_v0  ;;  %s2273_s26 = scalar_lea.vmem %s2272_s24, 768  ;;  %p2274_p10 = scmp.lt.s32.totalorder %s2727_s28, %s2272_s24 }
  0xbb   : > { %1736 = vmatmul.mubr.f32.gmra.mrb[14].mxu0 %v664_v48  ;;  %1776 = vmatprep.mubr.msk.f32.mxu1 %vm2344_vm0, %v2345_v1  ;;  %v1087_v48 = vld [vmem:[#allocation5 + $0x440] sm:$0xff]  ;;  %p2275_p13 = scmp.lt.s32.totalorder %s2273_s26, %s2267_s12 }
  0xbc   : > { %2054 = vmatpush3.bf16.msra.mxu0 %v2053_v49  ;;  %1777 = vmatmul.mubr.f32.gmra.mrb[14].mxu1 %v767_v51  ;;  %v1088_v49 = vld [vmem:[#allocation5 + $0x448] sm:$0xff]  ;;  %v1089_v51 = vld [vmem:[#allocation5 + $0x450] sm:$0xff] }
  0xbd   : > { %2078 = vmatpush3.bf16.msra.mxu1 %v2077_v50  ;;  %1738 = vmatprep.mubr.msk.f32.mxu0 %vm2344_vm0, %v2345_v1  ;;  %v2110_v50 = vpack.c.bf16 %v1088_v49, %v1087_v48  ;;  %v2113_v53 = vpack.c.bf16 %v1090_v52, %v1089_v51  ;;  %p2276_p3 = por %p2275_p13, %p2274_p10 }
  0xbe   : > { %2055 = vmatprep.subr.bf16.mxu0 %v2343_v0  ;;  %2079 = vmatprep.subr.bf16.mxu1 %v2343_v0 }
  0xbf   : > { %1739 = vmatmul.mubr.f32.gmra.mrb[16].mxu0 %v665_v56  ;;  %1779 = vmatprep.mubr.msk.f32.mxu1 %vm2344_vm0, %v2345_v1  ;;  %v2116_v56 = vpack.c.bf16 %v1092_v55, %v1091_v54  ;;  %p2277_p7 = pnand %p2276_p3, %p2270_p8 }
  0xc0   : > { %2057 = vmatpush3.bf16.msra.mxu0 %v2056_v57  ;;  %1780 = vmatmul.mubr.f32.gmra.mrb[16].mxu1 %v768_v59  ;;  %v1093_v57 = vld [vmem:[#allocation5 + $0x470] sm:$0xff] }
  0xc1   : > { %2081 = vmatpush3.bf16.msra.mxu1 %v2080_v58  ;;  %2058 = vmatprep.subr.bf16.mxu0 %v2343_v0  ;;  %v1094_v58 = vld [vmem:[#allocation5 + $0x478] sm:$0xff] }
  0xc2   : > { %2082 = vmatprep.subr.bf16.mxu1 %v2343_v0  ;;  %1814 = vmatprep.mubr.msk.f32.mxu0 %vm2344_vm0, %v2345_v1  ;;  %v2119_v59 = vpack.c.bf16 %v1094_v58, %v1093_v57 }
  0xc3   : > { %1855 = vmatprep.mubr.msk.f32.mxu1 %vm2344_vm0, %v2345_v1 }
  0xc4   : > { %2060 = vmatpush3.bf16.msra.mxu0 %v2059_v2 }
  0xc5   : > { %2084 = vmatpush3.bf16.msra.mxu1 %v2083_v3  ;;  %2061 = vmatprep.subr.bf16.mxu0 %v2343_v0 }
  0xc6   : > { %2085 = vmatprep.subr.bf16.mxu1 %v2343_v0 }
  0xc8   : > { %2063 = vmatpush3.bf16.msra.mxu0 %v2062_v9 }
  0xc9   : > { %2087 = vmatpush3.bf16.msra.mxu1 %v2086_v10  ;;  %2064 = vmatprep.subr.bf16.mxu0 %v2343_v0 }
  0xca   : > { %2088 = vmatprep.subr.bf16.mxu1 %v2343_v0 }
  0xcc   : > { %2066 = vmatpush3.bf16.msra.mxu0 %v2065_v16 }
  0xcd   : > { %2090 = vmatpush3.bf16.msra.mxu1 %v2089_v17  ;;  %2067 = vmatprep.subr.bf16.mxu0 %v2343_v0 }
  0xce   : > { %2091 = vmatprep.subr.bf16.mxu1 %v2343_v0 }
  0xd0   : > { %2069 = vmatpush3.bf16.msra.mxu0 %v2068_v22 }
  0xd1   : > { %2093 = vmatpush3.bf16.msra.mxu1 %v2092_v23  ;;  %2070 = vmatprep.subr.bf16.mxu0 %v2343_v0 }
  0xd2   : > { %2094 = vmatprep.subr.bf16.mxu1 %v2343_v0 }
  0xd4   : > { %2072 = vmatpush3.bf16.msra.mxu0 %v2071_v28 }
  0xd5   : > { %2096 = vmatpush3.bf16.msra.mxu1 %v2095_v29  ;;  %2097 = vmatprep.subr.bf16.mxu0 %v2343_v0 }
  0xd6   : > { %2121 = vmatprep.subr.bf16.mxu1 %v2343_v0 }
  0xd7   : > { %1815 = vmatmul.mubr.f32.vlgmr.msra.gmra.mrb[18].mxu0 %v869_v32 }
  0xd8   : > { %1856 = vmatmul.mubr.f32.vlgmr.msra.gmra.mrb[18].mxu1 %v972_v34  ;;  %2099 = vmatpush3.bf16.msra.mxu0 %v2098_v33 }
  0xd9   : > { %2129 = vmatpush3.bf16.msra.mxu1 %v2098_v33  ;;  %1817 = vmatprep.mubr.msk.f32.mxu0 %vm2344_vm0, %v2345_v1 }
  0xda   : > { %2100 = vmatprep.subr.bf16.mxu0 %v2343_v0  ;;  %2122 = vmatprep.subr.bf16.mxu1 %v2343_v0 }
  0xdb   : > { %1818 = vmatmul.mubr.f32.gmra.mrb[20].mxu0 %v870_v37  ;;  %1858 = vmatprep.mubr.msk.f32.mxu1 %vm2344_vm0, %v2345_v1 }
  0xdc   : > { %2102 = vmatpush3.bf16.msra.mxu0 %v2101_v38  ;;  %1859 = vmatmul.mubr.f32.gmra.mrb[20].mxu1 %v973_v39 }
  0xdd   : > { %2130 = vmatpush3.bf16.msra.mxu1 %v2101_v38  ;;  %1820 = vmatprep.mubr.msk.f32.mxu0 %vm2344_vm0, %v2345_v1 }
  0xde   : > { %2103 = vmatprep.subr.bf16.mxu0 %v2343_v0  ;;  %2123 = vmatprep.subr.bf16.mxu1 %v2343_v0 }
  0xdf   : > { %1821 = vmatmul.mubr.f32.gmra.mrb[22].mxu0 %v871_v42  ;;  %1861 = vmatprep.mubr.msk.f32.mxu1 %vm2344_vm0, %v2345_v1 }
  0xe0   : > { %2105 = vmatpush3.bf16.msra.mxu0 %v2104_v43  ;;  %1862 = vmatmul.mubr.f32.gmra.mrb[22].mxu1 %v974_v44 }
  0xe1   : > { %2131 = vmatpush3.bf16.msra.mxu1 %v2104_v43  ;;  %2106 = vmatprep.subr.bf16.mxu0 %v2343_v0 }
  0xe2   : > { %2124 = vmatprep.subr.bf16.mxu1 %v2343_v0  ;;  %1896 = vmatprep.mubr.msk.f32.mxu0 %vm2344_vm0, %v2345_v1 }
  0xe3   : > { %1899 = vmatprep.mubr.msk.f32.mxu1 %vm2344_vm0, %v2345_v1 }
  0xe4   : > { %2108 = vmatpush3.bf16.msra.mxu0 %v2107_v47 }
  0xe5   : > { %2132 = vmatpush3.bf16.msra.mxu1 %v2107_v47  ;;  %2109 = vmatprep.subr.bf16.mxu0 %v2343_v0 }
  0xe6   : > { %2125 = vmatprep.subr.bf16.mxu1 %v2343_v0 }
  0xe8   : > { %2111 = vmatpush3.bf16.msra.mxu0 %v2110_v50 }
  0xe9   : > { %2133 = vmatpush3.bf16.msra.mxu1 %v2110_v50  ;;  %2112 = vmatprep.subr.bf16.mxu0 %v2343_v0 }
  0xea   : > { %2126 = vmatprep.subr.bf16.mxu1 %v2343_v0 }
  0xec   : > { %2114 = vmatpush3.bf16.msra.mxu0 %v2113_v53 }
  0xed   : > { %2134 = vmatpush3.bf16.msra.mxu1 %v2113_v53  ;;  %2115 = vmatprep.subr.bf16.mxu0 %v2343_v0 }
  0xee   : > { %2127 = vmatprep.subr.bf16.mxu1 %v2343_v0 }
  0xf0   : > { %2117 = vmatpush3.bf16.msra.mxu0 %v2116_v56 }
  0xf1   : > { %2135 = vmatpush3.bf16.msra.mxu1 %v2116_v56  ;;  %2118 = vmatprep.subr.bf16.mxu0 %v2343_v0 }
  0xf2   : > { %2128 = vmatprep.subr.bf16.mxu1 %v2343_v0 }
  0xf4   : > { %2120 = vmatpush3.bf16.msra.mxu0 %v2119_v59 }
  0xf5   : > { %2136 = vmatpush3.bf16.msra.mxu1 %v2119_v59 }
  0xf7   : > { %1897 = vmatmul.mubr.f32.vlgmr.msra.gmra.mrb[24].mxu0 %v2565_v5 }
  0xf8   : > { %1900 = vmatmul.mubr.f32.vlgmr.msra.gmra.mrb[24].mxu1 %v2576_v13 }
  0xf9   : > { %1902 = vmatprep.mubr.msk.f32.mxu1 %vm2344_vm0, %v2345_v1 }
  0xfc   : > { %1903 = vmatmul.mubr.f32.gmra.mrb[26].mxu1 %v2705_v60 }
 0x14a   : > { %v363_v61 = vpop.f32.mrb[0].mxu0 }
 0x14b   : > { %v443_v62 = vpop.f32.mrb[0].mxu1  ;;  %v1570_v63 = vpop.f32.mrb[1].mxu0 }
 0x14c   : > { %v444_v2 = vadd.f32 %v443_v62, %v363_v61  ;;  %v1611_v3 = vpop.f32.mrb[1].mxu1 }
 0x14e   : > { %v368_v4 = vpop.f32.mrb[2].mxu0 }
 0x14f   : > { %v448_v0 = vpop.f32.mrb[2].mxu1  ;;  %v1573_v6 = vpop.f32.mrb[3].mxu0 }
 0x150   : > { %v449_v7 = vadd.f32 %v448_v0, %v368_v4  ;;  %v1614_v8 = vpop.f32.mrb[3].mxu1 }
 0x151   : > { %v1358_v8 = vld [vmem:[%s2773_s2] ss:$0 sm:$0xff] }
 0x152   : > { %v373_v9 = vpop.f32.mrb[4].mxu0 }
 0x153   : > { %v453_v10 = vpop.f32.mrb[4].mxu1  ;;  %v1576_v11 = vpop.f32.mrb[5].mxu0 }
 0x154   : > { %v454_v12 = vadd.f32 %v453_v10, %v373_v9  ;;  %v1617_v14 = vpop.f32.mrb[5].mxu1 }
 0x16a   : > { %v543_v1 = vpop.f32.mrb[6].mxu0 }
 0x16b   : > { %v557_v15 = vadd.f32 %v543_v1, %v444_v2  ;;  %v646_v16 = vpop.f32.mrb[6].mxu1  ;;  %v1652_v17 = vpop.f32.mrb[7].mxu0 }
 0x16c   : > { %v1693_v18 = vpop.f32.mrb[7].mxu1 }
 0x16d   : > { %v660_v19 = vadd.f32 %v646_v16, %v557_v15 }
 0x16e   : > { %v548_v20 = vpop.f32.mrb[8].mxu0 }
 0x16f   : > { %v558_v21 = vadd.f32 %v548_v20, %v449_v7  ;;  %v651_v22 = vpop.f32.mrb[8].mxu1  ;;  %v1655_v23 = vpop.f32.mrb[9].mxu0 }
 0x170   : > { %v1696_v24 = vpop.f32.mrb[9].mxu1 }
 0x171   : > { %v661_v25 = vadd.f32 %v651_v22, %v558_v21 }
 0x172   : > { %v553_v26 = vpop.f32.mrb[10].mxu0 }
 0x173   : > { %v559_v27 = vadd.f32 %v553_v26, %v454_v12  ;;  %v656_v28 = vpop.f32.mrb[10].mxu1  ;;  %v1658_v29 = vpop.f32.mrb[11].mxu0 }
 0x174   : > { %v1699_v30 = vpop.f32.mrb[11].mxu1 }
 0x175   : > { %v662_v31 = vadd.f32 %v656_v28, %v559_v27 }
 0x18a   : > { %v749_v32 = vpop.f32.mrb[12].mxu0 }
 0x18b   : > { %v763_v33 = vadd.f32 %v749_v32, %v660_v19  ;;  %v852_v34 = vpop.f32.mrb[12].mxu1  ;;  %v1734_v35 = vpop.f32.mrb[13].mxu0 }
 0x18c   : > { %v1775_v36 = vpop.f32.mrb[13].mxu1 }
 0x18d   : > { %v866_v37 = vadd.f32 %v852_v34, %v763_v33 }
 0x18e   : > { %v754_v38 = vpop.f32.mrb[14].mxu0 }
 0x18f   : > { %v764_v39 = vadd.f32 %v754_v38, %v661_v25  ;;  %v857_v40 = vpop.f32.mrb[14].mxu1  ;;  %v1737_v41 = vpop.f32.mrb[15].mxu0 }
 0x190   : > { %v1778_v42 = vpop.f32.mrb[15].mxu1 }
 0x191   : > { %v867_v43 = vadd.f32 %v857_v40, %v764_v39 }
 0x192   : > { %v759_v44 = vpop.f32.mrb[16].mxu0 }
 0x193   : > { %v765_v45 = vadd.f32 %v759_v44, %v662_v31  ;;  %v862_v46 = vpop.f32.mrb[16].mxu1  ;;  %v1740_v47 = vpop.f32.mrb[17].mxu0 }
 0x194   : > { %v1781_v48 = vpop.f32.mrb[17].mxu1  ;;  %v1360_v47 = vld [vmem:[%s2775_s4] ss:$0 sm:$0xff] }
 0x195   : > { %v868_v49 = vadd.f32 %v862_v46, %v765_v45  ;;  %v1359_v45 = vld [vmem:[%s2774_s3] ss:$0 sm:$0xff] }
 0x1aa   : > { %v955_v50 = vpop.f32.mrb[18].mxu0 }
 0x1ab   : > { %v969_v51 = vadd.f32 %v955_v50, %v866_v37  ;;  %v1058_v52 = vpop.f32.mrb[18].mxu1  ;;  %v1816_v53 = vpop.f32.mrb[19].mxu0 }
 0x1ac   : > { %v1857_v54 = vpop.f32.mrb[19].mxu1 }
 0x1ad   : > { %v1072_v55 = vadd.f32 %v1058_v52, %v969_v51 }
 0x1ae   : > { %v960_v56 = vpop.f32.mrb[20].mxu0 }
 0x1af   : > { %v970_v57 = vadd.f32 %v960_v56, %v867_v43  ;;  %v1063_v58 = vpop.f32.mrb[20].mxu1  ;;  %v1819_v59 = vpop.f32.mrb[21].mxu0 }
 0x1b0   : > { %v1860_v61 = vpop.f32.mrb[21].mxu1 }
 0x1b1   : > { %v1073_v62 = vadd.f32 %v1063_v58, %v970_v57 }
 0x1b2   : > { %v965_v63 = vpop.f32.mrb[22].mxu0 }
 0x1b3   : > { %v971_v2 = vadd.f32 %v965_v63, %v868_v49  ;;  %v1068_v3 = vpop.f32.mrb[22].mxu1  ;;  %v1822_v4 = vpop.f32.mrb[23].mxu0 }
 0x1b4   : > { %v1863_v0 = vpop.f32.mrb[23].mxu1 }
 0x1b5   : > { %v1074_v6 = vadd.f32 %v1068_v3, %v971_v2 }
 0x1ca   : > { %v1161_v7 = vpop.f32.mrb[24].mxu0 }
 0x1cb   : > { %v1175_v9 = vadd.f32 %v1161_v7, %v1072_v55  ;;  %v1166_v10 = vpop.f32.mrb[24].mxu1  ;;  %v1898_v11 = vpop.f32.mrb[25].mxu0 }
 0x1cc   : > { %v1176_v12 = vadd.f32 %v1166_v10, %v1073_v62  ;;  %v1901_v14 = vpop.f32.mrb[25].mxu1 }
 0x1cd   : > { %v1185_v1 = vadd.f32 %v1358_v8, %v1175_v9 }
 0x1ce   : > { %v1186_v15 = vadd.f32 %v1358_v8, %v1176_v12 }
 0x1cf   : > { %v1188_v16 = vmax.f32 %v1185_v1, 0.0  ;;  %v1171_v17 = vpop.f32.mrb[26].mxu1 }
 0x1d0   : > { %v1177_v18 = vadd.f32 %v1171_v17, %v1074_v6  ;;  %v1904_v19 = vpop.f32.mrb[27].mxu1  ;;  %v1189_v20 = vmax.f32 %v1186_v15, 0.0 }
 0x1d1   : > { %v1191_v21 = vadd.f32 %v1188_v16, %v2565_v5 }
 0x1d2   : > { %v1187_v22 = vadd.f32 %v1358_v8, %v1177_v18  ;;  %v1192_v24 = vadd.f32 %v1189_v20, %v2576_v13 }
 0x1d3   : > { %1194 = vadd.xlane.f32.xlu0 %v1191_v21 }
 0x1d4   : > { %v1190_v23 = vmax.f32 %v1187_v22, 0.0 }
 0x1d6   : > { %v1193_v25 = vadd.f32 %v1190_v23, %v2705_v60 }
 0x1d7   : > { %1196 = vadd.xlane.f32.xlu0 %v1192_v24 }
 0x1d8   : > { %1198 = vadd.xlane.f32.xlu1 %v1193_v25 }
 0x260   : > { %v1195_v26 = vpop.xlane.xlu0 %1194 }
 0x261   : > { %v1201_v27 = vmul.f32 0.0078125, %v1195_v26 }
 0x263   : > { %v1204_v28 = vsub.f32 %v1191_v21, %v1201_v27 }
 0x264   : > { %v1197_v29 = vpop.xlane.xlu0 %1196 }
 0x265   : > { %v1202_v30 = vmul.f32 0.0078125, %v1197_v29  ;;  %v1199_v31 = vpop.xlane.xlu1 %1198  ;;  %v1207_v32 = vmul.f32 %v1204_v28, %v1204_v28 }
 0x266   : > { %v1203_v33 = vmul.f32 0.0078125, %v1199_v31 }
 0x267   : > { %v1205_v34 = vsub.f32 %v1192_v24, %v1202_v30  ;;  %1210 = vadd.xlane.f32.xlu1 %v1207_v32 }
 0x268   : > { %v1206_v5 = vsub.f32 %v1193_v25, %v1203_v33 }
 0x269   : > { %v1208_v35 = vmul.f32 %v1205_v34, %v1205_v34 }
 0x26a   : > { %v1209_v36 = vmul.f32 %v1206_v5, %v1206_v5 }
 0x26b   : > { %1212 = vadd.xlane.f32.xlu0 %v1208_v35 }
 0x26c   : > { %1214 = vadd.xlane.f32.xlu1 %v1209_v36 }
 0x2f4   : > { %v1211_v13 = vpop.xlane.xlu1 %1210 }
 0x2f5   : > { %v1216_v60 = vmul.f32 0.0078125, %v1211_v13 }
 0x2f7   : > { %v1219_v37 = vadd.f32 1e-05, %v1216_v60 }
 0x2f8   : > { %v1213_v38 = vpop.xlane.xlu0 %1212 }
 0x2f9   : > { %2203 = vrsqrt.f32 %v1219_v37  ;;  %v1217_v39 = vmul.f32 0.0078125, %v1213_v38  ;;  %v1215_v40 = vpop.xlane.xlu1 %1214 }
 0x2fa   : > { %v1218_v41 = vmul.f32 0.0078125, %v1215_v40 }
 0x2fb   : > { %v1220_v42 = vadd.f32 1e-05, %v1217_v39 }
 0x2fc   : > { %v1221_v43 = vadd.f32 1e-05, %v1218_v41 }
 0x2fd   : > { %2205 = vrsqrt.f32 %v1220_v42 }
 0x2fe   : > { %2207 = vrsqrt.f32 %v1221_v43 }
 0x303   : > { %v2204_v44 = vpop.eup %2203 }
 0x304   : > { %v1225_v46 = vmul.f32 %v2204_v44, %v1204_v28 }
 0x306   : > { %v1235_v48 = vmul.f32 %v1359_v45, %v1225_v46 }
 0x307   : > { %v2206_v49 = vpop.eup %2205 }
 0x308   : > { %v2208_v50 = vpop.eup %2207  ;;  %v1245_v51 = vadd.f32 %v1360_v47, %v1235_v48  ;;  %v1226_v52 = vmul.f32 %v2206_v49, %v1205_v34 }
 0x309   : > { %v1227_v53 = vmul.f32 %v2208_v50, %v1206_v5 }
 0x30a   : > { %v1236_v54 = vmul.f32 %v1359_v45, %v1226_v52  ;;  %1248 = vst [vmem:[%s257_s29] sm:$0xff] %v1245_v51 }
 0x30b   : > { %v1237_v55 = vmul.f32 %v1359_v45, %v1227_v53 }
 0x30c   : > { %v1246_v56 = vadd.f32 %v1360_v47, %v1236_v54 }
 0x30d   : > { %v1247_v57 = vadd.f32 %v1360_v47, %v1237_v55 }
 0x30e   : > { %1249 = vst [vmem:[%s257_s29 + $0x8] sm:$0xff] %v1246_v56 }
 0x30f   : > { %1250 = vst [vmem:[%s257_s29 + $0x10] sm:$0xff] %v1247_v57 }
 0x310   : > { %2280 = shalt.err (!%p2277_p7)
}
 0x311   : > { %s2281_s16 = scalar_lea.hbm %s2725_s11, 384  ;;  %s2285_s6 = scalar_lea.hbm %s2776_s5, 768 }
 0x312   : > { %p2282_p9 = scmp.ne.s32.totalorder %s2725_s11, %s2281_s16  ;;  %p2286_p5 = scmp.lt.u32.totalorder %s2725_s11, %s2776_s5 }
 0x313   : > { %p2287_p11 = scmp.lt.u32.totalorder %s2285_s6, %s2281_s16  ;;  %p2289_p4 = scmp.lt.u32.totalorder %s2281_s16, %s2725_s11 }
 0x314   : > { %p2283_p1 = pnand %p2282_p9, %p2473_p12 }
 0x315   : > { %p2288_p2 = por %p2287_p11, %p2286_p5 }
 0x316   : > { %p2284_p0 = pneg %p2283_p1 }
 0x317   : > { %p2290_p6 = por %p2289_p4, %p2288_p2 }
 0x319   : > { %p2291_p8 = pnand %p2290_p6, %p2284_p0 }
 0x31b   : > { %2294 = shalt.err (!%p2291_p8)
}
 0x31c   : > { %s2347_s29 = smov 128   ;;  %s2348_s27 = smov 8  }
 0x31d   : > { %2145 = dma.vmem_to_hbm [thread:$0]  (%p2473_p12), %s2727_s28, 384, %s2725_s11, %s1252_s22, %s2347_s29, %s2347_s29, %s2348_s27  }
 0x31e PF: > { %s1280_s10 = sand.u32 1, %s2325_s18   ;;  %p2791_p10 = scmp.ne.s32.totalorder %s2781_s25, 0 }
 0x31f   : > { %p2792_p13 = scmp.ge.s32.totalorder %s2337_s21, 2  ;;  %s1281_s12 = scalar_lea.sflag [#allocation4], %s1280_s10 }
 0x321   : > { %p2156_p3 = pnand %p2792_p13, %p2791_p10 }
 0x323   : > { %2320 = dma.done.wait (!%p2156_p3), %s1281_s12, 384  }
 0x324   : > { %2322 = vsyncadd (!%p2156_p3), %s1281_s12, 4294966912  ;;  %p19_p7 = scmp.ge.s32.totalorder %s2435_s30, 4   ;;  %s2793_s18 = smov %s2329_s19 }
 0x325   : > { %s2794_s19 = smov %s2333_s20  ;;  %s2795_s20 = smov %s2469_s8 }
 0x326   : > { %s2796_s21 = smov %s2435_s30  ;;  %21 = sbr.rel (!%p19_p7) target bundleno = 6 (0x6), region = 97 }
 0x32d   :  { %1286 = vsyncpa [#allocation3], 1 }
 0x32e   :  { %1288 = vsyncpa [#allocation3 + $0x1], 1 }
 0x32f   :  { %1289 = vsyncpa [#allocation6], 1 }
 0x330   :  { %1290 = vsyncpa [#allocation4], 1 }
 0x331   :  { %1292 = vsyncpa [#allocation4 + $0x1], 1 }

</bundles_post_ra>
